<compile_context>
chip_gen: v7x
topology: tpu7x:2x2x1
jax: 0.10.0
libtpu: 0.0.40
codegen_flags: <defaults>
</compile_context>

<pallas_src>
import functools

import jax
import jax.numpy as jnp
from jax.experimental import pallas as pl
from jax.experimental.pallas import tpu as pltpu


# ----------------------------------------------------------------------------
# Pallas kernels
# ----------------------------------------------------------------------------
def _conv_kernel(x_ref, w_ref, b_ref, o_ref, *, leaky):
    # x_ref: (1, TM, K)      bf16  im2col patch rows (K = kh*kw*Cin)
    # w_ref: (K, Coutp)      bf16  BN scale folded in, Cout zero-padded to 128
    # b_ref: (1, Coutp)      f32   fused bias
    # o_ref: (1, TM, Coutp)  bf16  lane-dense output
    y = jnp.dot(x_ref[0], w_ref[...], preferred_element_type=jnp.float32)
    y = y + b_ref[...]
    if leaky:
        y = jnp.where(y > 0, y, 0.1 * y)                 # LeakyReLU(0.1)
    o_ref[0] = y.astype(o_ref.dtype)


def _conv_yolo_kernel(x_ref, w_ref, b_ref, anch_ref, o_ref, *, tm, grid_w,
                      num_anchors, bbox_attrs, det_stride):
    # Fused 1x1 detection-head conv + YOLO transform.  o_ref is f32.
    y = jnp.dot(x_ref[0], w_ref[...], preferred_element_type=jnp.float32)
    y = y + b_ref[...]

    col = jax.lax.broadcasted_iota(jnp.int32, y.shape, 1)
    # global flat cell index for each output row of this tile
    rf = (jax.lax.broadcasted_iota(jnp.int32, y.shape, 0)
          + pl.program_id(1) * tm).astype(jnp.float32)
    cy = jnp.floor((rf + 0.5) / grid_w)                  # row // grid_w
    cx = rf - cy * grid_w                                # row %  grid_w

    is_x = col < 0                                       # all-False
    is_y = col < 0
    is_wh = col < 0
    for a in range(num_anchors):                         # static unroll (A small)
        base = a * bbox_attrs
        is_x = is_x | (col == base)
        is_y = is_y | (col == base + 1)
        is_wh = is_wh | (col == base + 2) | (col == base + 3)

    # single exp per element: exp(y) on w/h columns, exp(-y) elsewhere
    ex = jnp.exp(jnp.where(is_wh, y, -y))
    sig = 1.0 / (1.0 + ex)                               # exact sigmoid off w/h
    off = jnp.where(is_x, cx, jnp.where(is_y, cy, 0.0))
    xy = (sig + off) * det_stride                        # (sigmoid + grid) * stride
    wh = ex * anch_ref[...]                              # exp(p) * anchor
    o_ref[0] = jnp.where(is_x | is_y, xy, jnp.where(is_wh, wh, sig))


def _add_kernel(a_ref, b_ref, o_ref):
    o_ref[...] = a_ref[...] + b_ref[...]


# ----------------------------------------------------------------------------
# Layer wrappers
# ----------------------------------------------------------------------------
def conv2d_bn_act(x_nhwc, w_hwio, scale, bias, *, stride, pad, leaky, yolo=None):
    N, H, W, Cin = x_nhwc.shape
    kh, kw, _, Cout = w_hwio.shape
    s = stride
    Ho = (H + 2 * pad - kh) // s + 1
    Wo = (W + 2 * pad - kw) // s + 1
    rows = Ho * Wo
    K = kh * kw * Cin
    Coutp = ((Cout + 127) // 128) * 128                  # lane-dense output channels

    # -- glue: cast to bf16 FIRST, then pad + fold the taps into the lane axis
    # (im2col with K = kh*kw*Cin).  Pure layout plumbing, tiny at these sizes.
    xb = x_nhwc.astype(jnp.bfloat16)
    xp = jnp.pad(xb, ((0, 0), (pad, pad), (pad, pad), (0, 0)))
    cols = []
    for dh in range(kh):
        for dw in range(kw):
            cols.append(xp[:, dh:dh + s * (Ho - 1) + 1:s,
                           dw:dw + s * (Wo - 1) + 1:s, :])
    patches = cols[0] if len(cols) == 1 else jnp.concatenate(cols, axis=-1)
    patches = patches.reshape(N, rows, K)

    # Fold BN scale into the weights, pad Cout -> Coutp, cast to bf16 for MXU.
    wf = (w_hwio * scale[None, None, None, :]).reshape(K, Cout)
    wf = jnp.pad(wf, ((0, 0), (0, Coutp - Cout))).astype(jnp.bfloat16)
    bf = jnp.pad(bias, (0, Coutp - Cout)).reshape(1, Coutp).astype(jnp.float32)

    # Row tiling: bounds the accumulator and feeds both v7x TensorCores.
    tm = 128 if (rows > 128 and rows % 128 == 0) else rows
    grid = (N, rows // tm)

    base_specs = [
        pl.BlockSpec((1, tm, K), lambda n, r: (n, r, 0)),
        pl.BlockSpec((K, Coutp), lambda n, r: (0, 0)),
        pl.BlockSpec((1, Coutp), lambda n, r: (0, 0)),
    ]

    if yolo is None:
        kernel = functools.partial(_conv_kernel, leaky=leaky)
        args = (patches, wf, bf)
        in_specs = base_specs
        out_dtype = jnp.bfloat16
    else:
        anchors_sel, num_classes, image_dim = yolo
        A, D = len(anchors_sel), 5 + num_classes
        det_stride = float(image_dim) / float(Ho)
        anch = jnp.ones((1, Coutp), jnp.float32)
        for a in range(A):
            anch = anch.at[0, a * D + 2].set(float(anchors_sel[a][0]))
            anch = anch.at[0, a * D + 3].set(float(anchors_sel[a][1]))
        kernel = functools.partial(_conv_yolo_kernel, tm=tm, grid_w=Wo,
                                   num_anchors=A, bbox_attrs=D,
                                   det_stride=det_stride)
        args = (patches, wf, bf, anch)
        in_specs = base_specs + [pl.BlockSpec((1, Coutp), lambda n, r: (0, 0))]
        out_dtype = jnp.float32

    out = pl.pallas_call(
        kernel,
        out_shape=jax.ShapeDtypeStruct((N, rows, Coutp), out_dtype),
        grid=grid,
        in_specs=in_specs,
        out_specs=pl.BlockSpec((1, tm, Coutp), lambda n, r: (n, r, 0)),
        compiler_params=pltpu.CompilerParams(
            dimension_semantics=("parallel", "parallel")),
    )(*args)

    if yolo is None:
        # TODO(synk): carrying the lane-padded (rows, 128) layout between
        # consecutive convs (skipping this slice) would save one more HBM pass;
        # kept unsliced-free here so routes/shortcuts see real channels only.
        return out.reshape(N, Ho, Wo, Coutp)[..., :Cout]
    A, D = len(yolo[0]), 5 + yolo[1]
    # (B, G*G, A*D) -> (B, G*G*A, D): cell-major, anchor-minor (matches torch)
    return out[:, :, :A * D].reshape(N, rows * A, D)


def shortcut_add(a, b):
    b = b.astype(a.dtype)
    shape, total = a.shape, a.size
    rows = -(-total // 128)
    rows = -(-rows // 16) * 16                           # bf16 sublane packing
    padn = rows * 128 - total
    af = jnp.pad(a.reshape(-1), (0, padn)).reshape(rows, 128)
    bf = jnp.pad(b.reshape(-1), (0, padn)).reshape(rows, 128)
    out = pl.pallas_call(                                # single lane-dense block
        _add_kernel,
        out_shape=jax.ShapeDtypeStruct((rows, 128), a.dtype),
    )(af, bf)
    return out.reshape(-1)[:total].reshape(shape)


def _interp_matrix(n_in, n_out):
    coords = jnp.arange(n_out, dtype=jnp.float32) * (n_in - 1) / (n_out - 1)
    lo = jnp.clip(jnp.floor(coords).astype(jnp.int32), 0, n_in - 1)
    hi = jnp.minimum(lo + 1, n_in - 1)
    frac = coords - lo.astype(jnp.float32)
    rows = jnp.arange(n_out)
    m = jnp.zeros((n_out, n_in), jnp.float32)
    m = m.at[rows, lo].add(1.0 - frac)
    m = m.at[rows, hi].add(frac)
    return m


# TODO(synk): bilinear upsample (align_corners=True, matching nn.Upsample) kept
# as plain-JAX interpolation-matrix einsum glue rather than a Pallas kernel.
def upsample_bilinear_nhwc(x, scale):
    N, H, W, C = x.shape
    Mh = _interp_matrix(H, H * scale)
    Mw = _interp_matrix(W, W * scale)
    return jnp.einsum('ip,jq,npqc->nijc', Mh, Mw, x).astype(x.dtype)


# ----------------------------------------------------------------------------
# Darknet definition (synthetic in-script config; mirrors parse_config output)
# ----------------------------------------------------------------------------
ANCHORS = '10,13, 16,30, 33,23, 30,61, 62,45, 59,119'
MODULE_DEFS = [
    {'type': 'net', 'channels': '4', 'height': '16'},
    {'type': 'convolutional', 'batch_normalize': '1', 'filters': '8',  'size': '3', 'stride': '1', 'pad': '1', 'activation': 'leaky'},
    {'type': 'convolutional', 'batch_normalize': '1', 'filters': '16', 'size': '3', 'stride': '2', 'pad': '1', 'activation': 'leaky'},
    {'type': 'convolutional', 'batch_normalize': '1', 'filters': '16', 'size': '1', 'stride': '1', 'pad': '1', 'activation': 'leaky'},
    {'type': 'shortcut', 'from': '-2', 'activation': 'linear'},
    {'type': 'convolutional', 'batch_normalize': '1', 'filters': '32', 'size': '3', 'stride': '2', 'pad': '1', 'activation': 'leaky'},
    {'type': 'convolutional', 'batch_normalize': '0', 'filters': '21', 'size': '1', 'stride': '1', 'pad': '1', 'activation': 'linear'},
    {'type': 'yolo', 'mask': '0,1,2', 'anchors': ANCHORS, 'classes': '2'},
    {'type': 'route', 'layers': '-3'},
    {'type': 'convolutional', 'batch_normalize': '1', 'filters': '8', 'size': '1', 'stride': '1', 'pad': '1', 'activation': 'leaky'},
    {'type': 'upsample', 'stride': '2'},
    {'type': 'route', 'layers': '-1, 3'},
    {'type': 'convolutional', 'batch_normalize': '1', 'filters': '16', 'size': '3', 'stride': '1', 'pad': '1', 'activation': 'leaky'},
    {'type': 'convolutional', 'batch_normalize': '0', 'filters': '21', 'size': '1', 'stride': '1', 'pad': '1', 'activation': 'linear'},
    {'type': 'yolo', 'mask': '3,4,5', 'anchors': ANCHORS, 'classes': '2'},
]


def build_params(module_defs, key):
    """Deterministic synthetic weights. BN is fused to (scale, bias) using
    running stats (inference-mode BatchNorm)."""
    out_filters = [int(module_defs[0]['channels'])]
    params = {}
    filters = out_filters[0]
    for i, md in enumerate(module_defs[1:]):
        t = md['type']
        if t == 'convolutional':
            bn = int(md['batch_normalize'])
            cin, cout, k = out_filters[-1], int(md['filters']), int(md['size'])
            key, k1, k2, k3, k4, k5 = jax.random.split(key, 6)
            w = jax.random.normal(k1, (k, k, cin, cout), jnp.float32)
            w = w * (1.0 / (k * k * cin)) ** 0.5
            if bn:
                gamma = 1.0 + 0.1 * jax.random.normal(k2, (cout,), jnp.float32)
                beta = 0.1 * jax.random.normal(k3, (cout,), jnp.float32)
                rmean = 0.1 * jax.random.normal(k4, (cout,), jnp.float32)
                rvar = 0.5 + jax.random.uniform(k5, (cout,), jnp.float32)
                scale = gamma / jnp.sqrt(rvar + 1e-5)
                bias = beta - rmean * scale
            else:
                scale = jnp.ones((cout,), jnp.float32)
                bias = 0.1 * jax.random.normal(k2, (cout,), jnp.float32)
            params[i] = {'w': w, 'scale': scale, 'bias': bias}
            filters = cout
        elif t == 'route':
            layers = [int(v) for v in md['layers'].split(',')]
            filters = sum(out_filters[l] for l in layers)
        elif t == 'shortcut':
            filters = out_filters[int(md['from'])]
        out_filters.append(filters)
    return params


def darknet_forward(x_nchw, params, module_defs):
    image_dim = int(module_defs[0]['height'])
    defs = module_defs[1:]
    x = jnp.transpose(x_nchw, (0, 2, 3, 1)).astype(jnp.float32)  # NCHW -> NHWC
    outputs = []
    detections = None
    i = 0
    while i < len(defs):
        md = defs[i]
        t = md['type']
        if t == 'convolutional':
            k = int(md['size'])
            pad = (k - 1) // 2 if int(md['pad']) else 0
            p = params[i]
            nxt = defs[i + 1] if i + 1 < len(defs) else None
            if nxt is not None and nxt['type'] == 'yolo':
                # fuse the (linear) detection-head conv with the YOLO transform
                mask = [int(v) for v in nxt['mask'].split(',')]
                av = [int(v) for v in nxt['anchors'].split(',')]
                av = [(av[j], av[j + 1]) for j in range(0, len(av), 2)]
                anchors_sel = [av[j] for j in mask]
                x = conv2d_bn_act(x, p['w'], p['scale'], p['bias'],
                                  stride=int(md['stride']), pad=pad, leaky=False,
                                  yolo=(anchors_sel, int(nxt['classes']), image_dim))
                detections = x if detections is None else jnp.concatenate(
                    [detections, x], axis=1)
                outputs.append(x)   # slot for the head conv (never routed from)
                outputs.append(x)   # slot for the yolo layer
                i += 2
                continue
            x = conv2d_bn_act(x, p['w'], p['scale'], p['bias'],
                              stride=int(md['stride']), pad=pad,
                              leaky=(md['activation'] == 'leaky'))
        elif t == 'upsample':
            x = upsample_bilinear_nhwc(x, int(md['stride']))
        elif t == 'route':
            layers = [int(v) for v in md['layers'].split(',')]
            x = jnp.concatenate([outputs[l] for l in layers], axis=-1)
        elif t == 'shortcut':
            x = shortcut_add(outputs[-1], outputs[int(md['from'])])
        outputs.append(x)
        i += 1
    return detections


if __name__ == "__main__":
    key = jax.random.PRNGKey(0)
    key, pkey, xkey = jax.random.split(key, 3)
    params = build_params(MODULE_DEFS, pkey)
    x = jax.random.normal(xkey, (2, 4, 16, 16), jnp.float32)  # NCHW like PyTorch

    fwd = jax.jit(functools.partial(darknet_forward, module_defs=MODULE_DEFS))
    det = jax.block_until_ready(fwd(x, params))

    # Two YOLO heads: 4*4*3 + 8*8*3 = 240 predictions, 5 + 2 classes = 7 attrs
    assert det.shape == (2, 240, 7), det.shape
    assert bool(jnp.all(jnp.isfinite(det)))
    print("KERNEL_OK")
</pallas_src>

<mosaic_0001>
module attributes {stable_mosaic.version = 11 : i64} {
  func.func @_conv_kernel(%arg0: i32, %arg1: i32, %arg2: memref<1x128x36xbf16, #tpu.memory_space<vmem>>, %arg3: memref<36x128xbf16, #tpu.memory_space<vmem>>, %arg4: memref<1x128xf32, #tpu.memory_space<vmem>>, %arg5: memref<1x128x128xbf16, #tpu.memory_space<vmem>>) attributes {dimension_semantics = [#tpu.dimension_semantics<parallel>, #tpu.dimension_semantics<parallel>], iteration_bounds = array<i64: 2, 2>, scalar_prefetch = 0 : i64, scratch_operands = 0 : i64, tpu.core_type = #tpu.core_type<tc>, window_params = [{transform_indices = @transform_0, window_bounds = array<i64: 1, 128, 36>}, {pipeline_mode = #tpu.pipeline_mode<synchronous>, transform_indices = @transform_1, window_bounds = array<i64: 36, 128>}, {pipeline_mode = #tpu.pipeline_mode<synchronous>, transform_indices = @transform_2, window_bounds = array<i64: 1, 128>}, {transform_indices = @transform_3, window_bounds = array<i64: 1, 128, 128>}]} {
    %c0 = arith.constant 0 : index
    %c0_0 = arith.constant 0 : index
    %c0_1 = arith.constant 0 : index
    %0 = vector.load %arg2[%c0, %c0_0, %c0_1] : memref<1x128x36xbf16, #tpu.memory_space<vmem>>, vector<1x128x36xbf16>
    %1 = vector.shape_cast %0 : vector<1x128x36xbf16> to vector<128x36xbf16>
    %c0_2 = arith.constant 0 : index
    %c0_3 = arith.constant 0 : index
    %2 = vector.load %arg3[%c0_2, %c0_3] : memref<36x128xbf16, #tpu.memory_space<vmem>>, vector<36x128xbf16>
    %cst = arith.constant dense<0.000000e+00> : vector<128x128xf32>
    %3 = tpu.matmul %1, %2, %cst {dimension_numbers = #tpu.dot_dimension_numbers<[1], [0], [0], [1], [0, 0, 1, 1], [], []>} : vector<128x36xbf16>, vector<36x128xbf16>, vector<128x128xf32> -> vector<128x128xf32>
    %c0_4 = arith.constant 0 : index
    %c0_5 = arith.constant 0 : index
    %4 = vector.load %arg4[%c0_4, %c0_5] : memref<1x128xf32, #tpu.memory_space<vmem>>, vector<1x128xf32>
    %5 = vector.broadcast %4 : vector<1x128xf32> to vector<128x128xf32>
    %6 = arith.addf %3, %5 : vector<128x128xf32>
    %cst_6 = arith.constant 0.000000e+00 : f32
    %7 = vector.broadcast %cst_6 : f32 to vector<128x128xf32>
    %8 = arith.cmpf ogt, %6, %7 : vector<128x128xf32>
    %cst_7 = arith.constant 1.000000e-01 : f32
    %9 = vector.broadcast %cst_7 : f32 to vector<128x128xf32>
    %10 = arith.mulf %9, %6 : vector<128x128xf32>
    %11 = arith.select %8, %6, %10 : vector<128x128xi1>, vector<128x128xf32>
    %12 = arith.truncf %11 : vector<128x128xf32> to vector<128x128xbf16>
    %c0_8 = arith.constant 0 : index
    %c0_9 = arith.constant 0 : index
    %c0_10 = arith.constant 0 : index
    %13 = vector.load %arg5[%c0_8, %c0_9, %c0_10] : memref<1x128x128xbf16, #tpu.memory_space<vmem>>, vector<1x128x128xbf16>
    %14 = vector.shape_cast %13 : vector<1x128x128xbf16> to vector<128x128xbf16>
    %15 = vector.shape_cast %12 : vector<128x128xbf16> to vector<1x128x128xbf16>
    tpu.vector_store %arg5[%c0_8, %c0_9, %c0_10], %15 {strides = array<i32>} : memref<1x128x128xbf16, #tpu.memory_space<vmem>>, vector<1x128x128xbf16>,
    return
  }
  func.func @transform_0(%arg0: i32, %arg1: i32) -> (i32, i32, i32) {
    %c0_i32 = arith.constant 0 : i32
    %c0_i32_0 = arith.constant 0 : i32
    return %arg0, %arg1, %c0_i32 : i32, i32, i32
  }
  func.func @transform_1(%arg0: i32, %arg1: i32) -> (i32, i32) {
    %c0_i32 = arith.constant 0 : i32
    %c0_i32_0 = arith.constant 0 : i32
    %c0_i32_1 = arith.constant 0 : i32
    return %c0_i32, %c0_i32_0 : i32, i32
  }
  func.func @transform_2(%arg0: i32, %arg1: i32) -> (i32, i32) {
    %c0_i32 = arith.constant 0 : i32
    %c0_i32_0 = arith.constant 0 : i32
    %c0_i32_1 = arith.constant 0 : i32
    return %c0_i32, %c0_i32_0 : i32, i32
  }
  func.func @transform_3(%arg0: i32, %arg1: i32) -> (i32, i32, i32) {
    %c0_i32 = arith.constant 0 : i32
    %c0_i32_0 = arith.constant 0 : i32
    return %arg0, %arg1, %c0_i32 : i32, i32, i32
  }
}

module attributes {stable_mosaic.version = 11 : i64} {
  func.func @_conv_kernel(%arg0: i32, %arg1: i32, %arg2: memref<1x64x72xbf16, #tpu.memory_space<vmem>>, %arg3: memref<72x128xbf16, #tpu.memory_space<vmem>>, %arg4: memref<1x128xf32, #tpu.memory_space<vmem>>, %arg5: memref<1x64x128xbf16, #tpu.memory_space<vmem>>) attributes {dimension_semantics = [#tpu.dimension_semantics<parallel>, #tpu.dimension_semantics<parallel>], iteration_bounds = array<i64: 2, 1>, scalar_prefetch = 0 : i64, scratch_operands = 0 : i64, tpu.core_type = #tpu.core_type<tc>, window_params = [{transform_indices = @transform_0, window_bounds = array<i64: 1, 64, 72>}, {pipeline_mode = #tpu.pipeline_mode<synchronous>, transform_indices = @transform_1, window_bounds = array<i64: 72, 128>}, {pipeline_mode = #tpu.pipeline_mode<synchronous>, transform_indices = @transform_2, window_bounds = array<i64: 1, 128>}, {transform_indices = @transform_3, window_bounds = array<i64: 1, 64, 128>}]} {
    %c0 = arith.constant 0 : index
    %c0_0 = arith.constant 0 : index
    %c0_1 = arith.constant 0 : index
    %0 = vector.load %arg2[%c0, %c0_0, %c0_1] : memref<1x64x72xbf16, #tpu.memory_space<vmem>>, vector<1x64x72xbf16>
    %1 = vector.shape_cast %0 : vector<1x64x72xbf16> to vector<64x72xbf16>
    %c0_2 = arith.constant 0 : index
    %c0_3 = arith.constant 0 : index
    %2 = vector.load %arg3[%c0_2, %c0_3] : memref<72x128xbf16, #tpu.memory_space<vmem>>, vector<72x128xbf16>
    %cst = arith.constant dense<0.000000e+00> : vector<64x128xf32>
    %3 = tpu.matmul %1, %2, %cst {dimension_numbers = #tpu.dot_dimension_numbers<[1], [0], [0], [1], [0, 0, 1, 1], [], []>} : vector<64x72xbf16>, vector<72x128xbf16>, vector<64x128xf32> -> vector<64x128xf32>
    %c0_4 = arith.constant 0 : index
    %c0_5 = arith.constant 0 : index
    %4 = vector.load %arg4[%c0_4, %c0_5] : memref<1x128xf32, #tpu.memory_space<vmem>>, vector<1x128xf32>
    %5 = vector.broadcast %4 : vector<1x128xf32> to vector<64x128xf32>
    %6 = arith.addf %3, %5 : vector<64x128xf32>
    %cst_6 = arith.constant 0.000000e+00 : f32
    %7 = vector.broadcast %cst_6 : f32 to vector<64x128xf32>
    %8 = arith.cmpf ogt, %6, %7 : vector<64x128xf32>
    %cst_7 = arith.constant 1.000000e-01 : f32
    %9 = vector.broadcast %cst_7 : f32 to vector<64x128xf32>
    %10 = arith.mulf %9, %6 : vector<64x128xf32>
    %11 = arith.select %8, %6, %10 : vector<64x128xi1>, vector<64x128xf32>
    %12 = arith.truncf %11 : vector<64x128xf32> to vector<64x128xbf16>
    %c0_8 = arith.constant 0 : index
    %c0_9 = arith.constant 0 : index
    %c0_10 = arith.constant 0 : index
    %13 = vector.load %arg5[%c0_8, %c0_9, %c0_10] : memref<1x64x128xbf16, #tpu.memory_space<vmem>>, vector<1x64x128xbf16>
    %14 = vector.shape_cast %13 : vector<1x64x128xbf16> to vector<64x128xbf16>
    %15 = vector.shape_cast %12 : vector<64x128xbf16> to vector<1x64x128xbf16>
    tpu.vector_store %arg5[%c0_8, %c0_9, %c0_10], %15 {strides = array<i32>} : memref<1x64x128xbf16, #tpu.memory_space<vmem>>, vector<1x64x128xbf16>,
    return
  }
  func.func @transform_0(%arg0: i32, %arg1: i32) -> (i32, i32, i32) {
    %c0_i32 = arith.constant 0 : i32
    %c0_i32_0 = arith.constant 0 : i32
    return %arg0, %arg1, %c0_i32 : i32, i32, i32
  }
  func.func @transform_1(%arg0: i32, %arg1: i32) -> (i32, i32) {
    %c0_i32 = arith.constant 0 : i32
    %c0_i32_0 = arith.constant 0 : i32
    %c0_i32_1 = arith.constant 0 : i32
    return %c0_i32, %c0_i32_0 : i32, i32
  }
  func.func @transform_2(%arg0: i32, %arg1: i32) -> (i32, i32) {
    %c0_i32 = arith.constant 0 : i32
    %c0_i32_0 = arith.constant 0 : i32
    %c0_i32_1 = arith.constant 0 : i32
    return %c0_i32, %c0_i32_0 : i32, i32
  }
  func.func @transform_3(%arg0: i32, %arg1: i32) -> (i32, i32, i32) {
    %c0_i32 = arith.constant 0 : i32
    %c0_i32_0 = arith.constant 0 : i32
    return %arg0, %arg1, %c0_i32 : i32, i32, i32
  }
}

module attributes {stable_mosaic.version = 11 : i64} {
  func.func @_conv_kernel(%arg0: i32, %arg1: i32, %arg2: memref<1x64x16xbf16, #tpu.memory_space<vmem>>, %arg3: memref<16x128xbf16, #tpu.memory_space<vmem>>, %arg4: memref<1x128xf32, #tpu.memory_space<vmem>>, %arg5: memref<1x64x128xbf16, #tpu.memory_space<vmem>>) attributes {dimension_semantics = [#tpu.dimension_semantics<parallel>, #tpu.dimension_semantics<parallel>], iteration_bounds = array<i64: 2, 1>, scalar_prefetch = 0 : i64, scratch_operands = 0 : i64, tpu.core_type = #tpu.core_type<tc>, window_params = [{transform_indices = @transform_0, window_bounds = array<i64: 1, 64, 16>}, {pipeline_mode = #tpu.pipeline_mode<synchronous>, transform_indices = @transform_1, window_bounds = array<i64: 16, 128>}, {pipeline_mode = #tpu.pipeline_mode<synchronous>, transform_indices = @transform_2, window_bounds = array<i64: 1, 128>}, {transform_indices = @transform_3, window_bounds = array<i64: 1, 64, 128>}]} {
    %c0 = arith.constant 0 : index
    %c0_0 = arith.constant 0 : index
    %c0_1 = arith.constant 0 : index
    %0 = vector.load %arg2[%c0, %c0_0, %c0_1] : memref<1x64x16xbf16, #tpu.memory_space<vmem>>, vector<1x64x16xbf16>
    %1 = vector.shape_cast %0 : vector<1x64x16xbf16> to vector<64x16xbf16>
    %c0_2 = arith.constant 0 : index
    %c0_3 = arith.constant 0 : index
    %2 = vector.load %arg3[%c0_2, %c0_3] : memref<16x128xbf16, #tpu.memory_space<vmem>>, vector<16x128xbf16>
    %cst = arith.constant dense<0.000000e+00> : vector<64x128xf32>
    %3 = tpu.matmul %1, %2, %cst {dimension_numbers = #tpu.dot_dimension_numbers<[1], [0], [0], [1], [0, 0, 1, 1], [], []>} : vector<64x16xbf16>, vector<16x128xbf16>, vector<64x128xf32> -> vector<64x128xf32>
    %c0_4 = arith.constant 0 : index
    %c0_5 = arith.constant 0 : index
    %4 = vector.load %arg4[%c0_4, %c0_5] : memref<1x128xf32, #tpu.memory_space<vmem>>, vector<1x128xf32>
    %5 = vector.broadcast %4 : vector<1x128xf32> to vector<64x128xf32>
    %6 = arith.addf %3, %5 : vector<64x128xf32>
    %cst_6 = arith.constant 0.000000e+00 : f32
    %7 = vector.broadcast %cst_6 : f32 to vector<64x128xf32>
    %8 = arith.cmpf ogt, %6, %7 : vector<64x128xf32>
    %cst_7 = arith.constant 1.000000e-01 : f32
    %9 = vector.broadcast %cst_7 : f32 to vector<64x128xf32>
    %10 = arith.mulf %9, %6 : vector<64x128xf32>
    %11 = arith.select %8, %6, %10 : vector<64x128xi1>, vector<64x128xf32>
    %12 = arith.truncf %11 : vector<64x128xf32> to vector<64x128xbf16>
    %c0_8 = arith.constant 0 : index
    %c0_9 = arith.constant 0 : index
    %c0_10 = arith.constant 0 : index
    %13 = vector.load %arg5[%c0_8, %c0_9, %c0_10] : memref<1x64x128xbf16, #tpu.memory_space<vmem>>, vector<1x64x128xbf16>
    %14 = vector.shape_cast %13 : vector<1x64x128xbf16> to vector<64x128xbf16>
    %15 = vector.shape_cast %12 : vector<64x128xbf16> to vector<1x64x128xbf16>
    tpu.vector_store %arg5[%c0_8, %c0_9, %c0_10], %15 {strides = array<i32>} : memref<1x64x128xbf16, #tpu.memory_space<vmem>>, vector<1x64x128xbf16>,
    return
  }
  func.func @transform_0(%arg0: i32, %arg1: i32) -> (i32, i32, i32) {
    %c0_i32 = arith.constant 0 : i32
    %c0_i32_0 = arith.constant 0 : i32
    return %arg0, %arg1, %c0_i32 : i32, i32, i32
  }
  func.func @transform_1(%arg0: i32, %arg1: i32) -> (i32, i32) {
    %c0_i32 = arith.constant 0 : i32
    %c0_i32_0 = arith.constant 0 : i32
    %c0_i32_1 = arith.constant 0 : i32
    return %c0_i32, %c0_i32_0 : i32, i32
  }
  func.func @transform_2(%arg0: i32, %arg1: i32) -> (i32, i32) {
    %c0_i32 = arith.constant 0 : i32
    %c0_i32_0 = arith.constant 0 : i32
    %c0_i32_1 = arith.constant 0 : i32
    return %c0_i32, %c0_i32_0 : i32, i32
  }
  func.func @transform_3(%arg0: i32, %arg1: i32) -> (i32, i32, i32) {
    %c0_i32 = arith.constant 0 : i32
    %c0_i32_0 = arith.constant 0 : i32
    return %arg0, %arg1, %c0_i32 : i32, i32, i32
  }
}

module attributes {stable_mosaic.version = 11 : i64} {
  func.func @_add_kernel(%arg0: memref<16x128xbf16, #tpu.memory_space<vmem>>, %arg1: memref<16x128xbf16, #tpu.memory_space<vmem>>, %arg2: memref<16x128xbf16, #tpu.memory_space<vmem>>) attributes {dimension_semantics = [], scalar_prefetch = 0 : i64, scratch_operands = 0 : i64, tpu.core_type = #tpu.core_type<tc>} {
    %c0 = arith.constant 0 : index
    %c0_0 = arith.constant 0 : index
    %0 = vector.load %arg0[%c0, %c0_0] : memref<16x128xbf16, #tpu.memory_space<vmem>>, vector<16x128xbf16>
    %c0_1 = arith.constant 0 : index
    %c0_2 = arith.constant 0 : index
    %1 = vector.load %arg1[%c0_1, %c0_2] : memref<16x128xbf16, #tpu.memory_space<vmem>>, vector<16x128xbf16>
    %2 = arith.addf %0, %1 : vector<16x128xbf16>
    %c0_3 = arith.constant 0 : index
    %c0_4 = arith.constant 0 : index
    %3 = vector.load %arg2[%c0_3, %c0_4] : memref<16x128xbf16, #tpu.memory_space<vmem>>, vector<16x128xbf16>
    tpu.vector_store %arg2[%c0_3, %c0_4], %2 {strides = array<i32>} : memref<16x128xbf16, #tpu.memory_space<vmem>>, vector<16x128xbf16>,
    return
  }
}

module attributes {stable_mosaic.version = 11 : i64} {
  func.func @_conv_kernel(%arg0: i32, %arg1: i32, %arg2: memref<1x16x32xbf16, #tpu.memory_space<vmem>>, %arg3: memref<32x128xbf16, #tpu.memory_space<vmem>>, %arg4: memref<1x128xf32, #tpu.memory_space<vmem>>, %arg5: memref<1x16x128xbf16, #tpu.memory_space<vmem>>) attributes {dimension_semantics = [#tpu.dimension_semantics<parallel>, #tpu.dimension_semantics<parallel>], iteration_bounds = array<i64: 2, 1>, scalar_prefetch = 0 : i64, scratch_operands = 0 : i64, tpu.core_type = #tpu.core_type<tc>, window_params = [{transform_indices = @transform_0, window_bounds = array<i64: 1, 16, 32>}, {pipeline_mode = #tpu.pipeline_mode<synchronous>, transform_indices = @transform_1, window_bounds = array<i64: 32, 128>}, {pipeline_mode = #tpu.pipeline_mode<synchronous>, transform_indices = @transform_2, window_bounds = array<i64: 1, 128>}, {transform_indices = @transform_3, window_bounds = array<i64: 1, 16, 128>}]} {
    %c0 = arith.constant 0 : index
    %c0_0 = arith.constant 0 : index
    %c0_1 = arith.constant 0 : index
    %0 = vector.load %arg2[%c0, %c0_0, %c0_1] : memref<1x16x32xbf16, #tpu.memory_space<vmem>>, vector<1x16x32xbf16>
    %1 = vector.shape_cast %0 : vector<1x16x32xbf16> to vector<16x32xbf16>
    %c0_2 = arith.constant 0 : index
    %c0_3 = arith.constant 0 : index
    %2 = vector.load %arg3[%c0_2, %c0_3] : memref<32x128xbf16, #tpu.memory_space<vmem>>, vector<32x128xbf16>
    %cst = arith.constant dense<0.000000e+00> : vector<16x128xf32>
    %3 = tpu.matmul %1, %2, %cst {dimension_numbers = #tpu.dot_dimension_numbers<[1], [0], [0], [1], [0, 0, 1, 1], [], []>} : vector<16x32xbf16>, vector<32x128xbf16>, vector<16x128xf32> -> vector<16x128xf32>
    %c0_4 = arith.constant 0 : index
    %c0_5 = arith.constant 0 : index
    %4 = vector.load %arg4[%c0_4, %c0_5] : memref<1x128xf32, #tpu.memory_space<vmem>>, vector<1x128xf32>
    %5 = vector.broadcast %4 : vector<1x128xf32> to vector<16x128xf32>
    %6 = arith.addf %3, %5 : vector<16x128xf32>
    %cst_6 = arith.constant 0.000000e+00 : f32
    %7 = vector.broadcast %cst_6 : f32 to vector<16x128xf32>
    %8 = arith.cmpf ogt, %6, %7 : vector<16x128xf32>
    %cst_7 = arith.constant 1.000000e-01 : f32
    %9 = vector.broadcast %cst_7 : f32 to vector<16x128xf32>
    %10 = arith.mulf %9, %6 : vector<16x128xf32>
    %11 = arith.select %8, %6, %10 : vector<16x128xi1>, vector<16x128xf32>
    %12 = arith.truncf %11 : vector<16x128xf32> to vector<16x128xbf16>
    %c0_8 = arith.constant 0 : index
    %c0_9 = arith.constant 0 : index
    %c0_10 = arith.constant 0 : index
    %13 = vector.load %arg5[%c0_8, %c0_9, %c0_10] : memref<1x16x128xbf16, #tpu.memory_space<vmem>>, vector<1x16x128xbf16>
    %14 = vector.shape_cast %13 : vector<1x16x128xbf16> to vector<16x128xbf16>
    %15 = vector.shape_cast %12 : vector<16x128xbf16> to vector<1x16x128xbf16>
    tpu.vector_store %arg5[%c0_8, %c0_9, %c0_10], %15 {strides = array<i32>} : memref<1x16x128xbf16, #tpu.memory_space<vmem>>, vector<1x16x128xbf16>,
    return
  }
  func.func @transform_0(%arg0: i32, %arg1: i32) -> (i32, i32, i32) {
    %c0_i32 = arith.constant 0 : i32
    %c0_i32_0 = arith.constant 0 : i32
    return %arg0, %arg1, %c0_i32 : i32, i32, i32
  }
  func.func @transform_1(%arg0: i32, %arg1: i32) -> (i32, i32) {
    %c0_i32 = arith.constant 0 : i32
    %c0_i32_0 = arith.constant 0 : i32
    %c0_i32_1 = arith.constant 0 : i32
    return %c0_i32, %c0_i32_0 : i32, i32
  }
  func.func @transform_2(%arg0: i32, %arg1: i32) -> (i32, i32) {
    %c0_i32 = arith.constant 0 : i32
    %c0_i32_0 = arith.constant 0 : i32
    %c0_i32_1 = arith.constant 0 : i32
    return %c0_i32, %c0_i32_0 : i32, i32
  }
  func.func @transform_3(%arg0: i32, %arg1: i32) -> (i32, i32, i32) {
    %c0_i32 = arith.constant 0 : i32
    %c0_i32_0 = arith.constant 0 : i32
    return %arg0, %arg1, %c0_i32 : i32, i32, i32
  }
}

module attributes {stable_mosaic.version = 11 : i64} {
  func.func @_conv_kernel(%arg0: i32, %arg1: i32, %arg2: memref<1x16x144xbf16, #tpu.memory_space<vmem>>, %arg3: memref<144x128xbf16, #tpu.memory_space<vmem>>, %arg4: memref<1x128xf32, #tpu.memory_space<vmem>>, %arg5: memref<1x16x128xbf16, #tpu.memory_space<vmem>>) attributes {dimension_semantics = [#tpu.dimension_semantics<parallel>, #tpu.dimension_semantics<parallel>], iteration_bounds = array<i64: 2, 1>, scalar_prefetch = 0 : i64, scratch_operands = 0 : i64, tpu.core_type = #tpu.core_type<tc>, window_params = [{transform_indices = @transform_0, window_bounds = array<i64: 1, 16, 144>}, {pipeline_mode = #tpu.pipeline_mode<synchronous>, transform_indices = @transform_1, window_bounds = array<i64: 144, 128>}, {pipeline_mode = #tpu.pipeline_mode<synchronous>, transform_indices = @transform_2, window_bounds = array<i64: 1, 128>}, {transform_indices = @transform_3, window_bounds = array<i64: 1, 16, 128>}]} {
    %c0 = arith.constant 0 : index
    %c0_0 = arith.constant 0 : index
    %c0_1 = arith.constant 0 : index
    %0 = vector.load %arg2[%c0, %c0_0, %c0_1] : memref<1x16x144xbf16, #tpu.memory_space<vmem>>, vector<1x16x144xbf16>
    %1 = vector.shape_cast %0 : vector<1x16x144xbf16> to vector<16x144xbf16>
    %c0_2 = arith.constant 0 : index
    %c0_3 = arith.constant 0 : index
    %2 = vector.load %arg3[%c0_2, %c0_3] : memref<144x128xbf16, #tpu.memory_space<vmem>>, vector<144x128xbf16>
    %cst = arith.constant dense<0.000000e+00> : vector<16x128xf32>
    %3 = tpu.matmul %1, %2, %cst {dimension_numbers = #tpu.dot_dimension_numbers<[1], [0], [0], [1], [0, 0, 1, 1], [], []>} : vector<16x144xbf16>, vector<144x128xbf16>, vector<16x128xf32> -> vector<16x128xf32>
    %c0_4 = arith.constant 0 : index
    %c0_5 = arith.constant 0 : index
    %4 = vector.load %arg4[%c0_4, %c0_5] : memref<1x128xf32, #tpu.memory_space<vmem>>, vector<1x128xf32>
    %5 = vector.broadcast %4 : vector<1x128xf32> to vector<16x128xf32>
    %6 = arith.addf %3, %5 : vector<16x128xf32>
    %cst_6 = arith.constant 0.000000e+00 : f32
    %7 = vector.broadcast %cst_6 : f32 to vector<16x128xf32>
    %8 = arith.cmpf ogt, %6, %7 : vector<16x128xf32>
    %cst_7 = arith.constant 1.000000e-01 : f32
    %9 = vector.broadcast %cst_7 : f32 to vector<16x128xf32>
    %10 = arith.mulf %9, %6 : vector<16x128xf32>
    %11 = arith.select %8, %6, %10 : vector<16x128xi1>, vector<16x128xf32>
    %12 = arith.truncf %11 : vector<16x128xf32> to vector<16x128xbf16>
    %c0_8 = arith.constant 0 : index
    %c0_9 = arith.constant 0 : index
    %c0_10 = arith.constant 0 : index
    %13 = vector.load %arg5[%c0_8, %c0_9, %c0_10] : memref<1x16x128xbf16, #tpu.memory_space<vmem>>, vector<1x16x128xbf16>
    %14 = vector.shape_cast %13 : vector<1x16x128xbf16> to vector<16x128xbf16>
    %15 = vector.shape_cast %12 : vector<16x128xbf16> to vector<1x16x128xbf16>
    tpu.vector_store %arg5[%c0_8, %c0_9, %c0_10], %15 {strides = array<i32>} : memref<1x16x128xbf16, #tpu.memory_space<vmem>>, vector<1x16x128xbf16>,
    return
  }
  func.func @transform_0(%arg0: i32, %arg1: i32) -> (i32, i32, i32) {
    %c0_i32 = arith.constant 0 : i32
    %c0_i32_0 = arith.constant 0 : i32
    return %arg0, %arg1, %c0_i32 : i32, i32, i32
  }
  func.func @transform_1(%arg0: i32, %arg1: i32) -> (i32, i32) {
    %c0_i32 = arith.constant 0 : i32
    %c0_i32_0 = arith.constant 0 : i32
    %c0_i32_1 = arith.constant 0 : i32
    return %c0_i32, %c0_i32_0 : i32, i32
  }
  func.func @transform_2(%arg0: i32, %arg1: i32) -> (i32, i32) {
    %c0_i32 = arith.constant 0 : i32
    %c0_i32_0 = arith.constant 0 : i32
    %c0_i32_1 = arith.constant 0 : i32
    return %c0_i32, %c0_i32_0 : i32, i32
  }
  func.func @transform_3(%arg0: i32, %arg1: i32) -> (i32, i32, i32) {
    %c0_i32 = arith.constant 0 : i32
    %c0_i32_0 = arith.constant 0 : i32
    return %arg0, %arg1, %c0_i32 : i32, i32, i32
  }
}

module attributes {stable_mosaic.version = 11 : i64} {
  func.func @_conv_kernel(%arg0: i32, %arg1: i32, %arg2: memref<1x64x216xbf16, #tpu.memory_space<vmem>>, %arg3: memref<216x128xbf16, #tpu.memory_space<vmem>>, %arg4: memref<1x128xf32, #tpu.memory_space<vmem>>, %arg5: memref<1x64x128xbf16, #tpu.memory_space<vmem>>) attributes {dimension_semantics = [#tpu.dimension_semantics<parallel>, #tpu.dimension_semantics<parallel>], iteration_bounds = array<i64: 2, 1>, scalar_prefetch = 0 : i64, scratch_operands = 0 : i64, tpu.core_type = #tpu.core_type<tc>, window_params = [{transform_indices = @transform_0, window_bounds = array<i64: 1, 64, 216>}, {pipeline_mode = #tpu.pipeline_mode<synchronous>, transform_indices = @transform_1, window_bounds = array<i64: 216, 128>}, {pipeline_mode = #tpu.pipeline_mode<synchronous>, transform_indices = @transform_2, window_bounds = array<i64: 1, 128>}, {transform_indices = @transform_3, window_bounds = array<i64: 1, 64, 128>}]} {
    %c0 = arith.constant 0 : index
    %c0_0 = arith.constant 0 : index
    %c0_1 = arith.constant 0 : index
    %0 = vector.load %arg2[%c0, %c0_0, %c0_1] : memref<1x64x216xbf16, #tpu.memory_space<vmem>>, vector<1x64x216xbf16>
    %1 = vector.shape_cast %0 : vector<1x64x216xbf16> to vector<64x216xbf16>
    %c0_2 = arith.constant 0 : index
    %c0_3 = arith.constant 0 : index
    %2 = vector.load %arg3[%c0_2, %c0_3] : memref<216x128xbf16, #tpu.memory_space<vmem>>, vector<216x128xbf16>
    %cst = arith.constant dense<0.000000e+00> : vector<64x128xf32>
    %3 = tpu.matmul %1, %2, %cst {dimension_numbers = #tpu.dot_dimension_numbers<[1], [0], [0], [1], [0, 0, 1, 1], [], []>} : vector<64x216xbf16>, vector<216x128xbf16>, vector<64x128xf32> -> vector<64x128xf32>
    %c0_4 = arith.constant 0 : index
    %c0_5 = arith.constant 0 : index
    %4 = vector.load %arg4[%c0_4, %c0_5] : memref<1x128xf32, #tpu.memory_space<vmem>>, vector<1x128xf32>
    %5 = vector.broadcast %4 : vector<1x128xf32> to vector<64x128xf32>
    %6 = arith.addf %3, %5 : vector<64x128xf32>
    %cst_6 = arith.constant 0.000000e+00 : f32
    %7 = vector.broadcast %cst_6 : f32 to vector<64x128xf32>
    %8 = arith.cmpf ogt, %6, %7 : vector<64x128xf32>
    %cst_7 = arith.constant 1.000000e-01 : f32
    %9 = vector.broadcast %cst_7 : f32 to vector<64x128xf32>
    %10 = arith.mulf %9, %6 : vector<64x128xf32>
    %11 = arith.select %8, %6, %10 : vector<64x128xi1>, vector<64x128xf32>
    %12 = arith.truncf %11 : vector<64x128xf32> to vector<64x128xbf16>
    %c0_8 = arith.constant 0 : index
    %c0_9 = arith.constant 0 : index
    %c0_10 = arith.constant 0 : index
    %13 = vector.load %arg5[%c0_8, %c0_9, %c0_10] : memref<1x64x128xbf16, #tpu.memory_space<vmem>>, vector<1x64x128xbf16>
    %14 = vector.shape_cast %13 : vector<1x64x128xbf16> to vector<64x128xbf16>
    %15 = vector.shape_cast %12 : vector<64x128xbf16> to vector<1x64x128xbf16>
    tpu.vector_store %arg5[%c0_8, %c0_9, %c0_10], %15 {strides = array<i32>} : memref<1x64x128xbf16, #tpu.memory_space<vmem>>, vector<1x64x128xbf16>,
    return
  }
  func.func @transform_0(%arg0: i32, %arg1: i32) -> (i32, i32, i32) {
    %c0_i32 = arith.constant 0 : i32
    %c0_i32_0 = arith.constant 0 : i32
    return %arg0, %arg1, %c0_i32 : i32, i32, i32
  }
  func.func @transform_1(%arg0: i32, %arg1: i32) -> (i32, i32) {
    %c0_i32 = arith.constant 0 : i32
    %c0_i32_0 = arith.constant 0 : i32
    %c0_i32_1 = arith.constant 0 : i32
    return %c0_i32, %c0_i32_0 : i32, i32
  }
  func.func @transform_2(%arg0: i32, %arg1: i32) -> (i32, i32) {
    %c0_i32 = arith.constant 0 : i32
    %c0_i32_0 = arith.constant 0 : i32
    %c0_i32_1 = arith.constant 0 : i32
    return %c0_i32, %c0_i32_0 : i32, i32
  }
  func.func @transform_3(%arg0: i32, %arg1: i32) -> (i32, i32, i32) {
    %c0_i32 = arith.constant 0 : i32
    %c0_i32_0 = arith.constant 0 : i32
    return %arg0, %arg1, %c0_i32 : i32, i32, i32
  }
}

module attributes {stable_mosaic.version = 11 : i64} {
  func.func @_conv_yolo_kernel(%arg0: i32, %arg1: i32, %arg2: memref<1x64x16xbf16, #tpu.memory_space<vmem>>, %arg3: memref<16x128xbf16, #tpu.memory_space<vmem>>, %arg4: memref<1x128xf32, #tpu.memory_space<vmem>>, %arg5: memref<1x128xf32, #tpu.memory_space<vmem>>, %arg6: memref<1x64x128xf32, #tpu.memory_space<vmem>>) attributes {dimension_semantics = [#tpu.dimension_semantics<parallel>, #tpu.dimension_semantics<parallel>], iteration_bounds = array<i64: 2, 1>, scalar_prefetch = 0 : i64, scratch_operands = 0 : i64, tpu.core_type = #tpu.core_type<tc>, window_params = [{transform_indices = @transform_0, window_bounds = array<i64: 1, 64, 16>}, {pipeline_mode = #tpu.pipeline_mode<synchronous>, transform_indices = @transform_1, window_bounds = array<i64: 16, 128>}, {pipeline_mode = #tpu.pipeline_mode<synchronous>, transform_indices = @transform_2, window_bounds = array<i64: 1, 128>}, {pipeline_mode = #tpu.pipeline_mode<synchronous>, transform_indices = @transform_3, window_bounds = array<i64: 1, 128>}, {transform_indices = @transform_4, window_bounds = array<i64: 1, 64, 128>}]} {
    %c0 = arith.constant 0 : index
    %c0_0 = arith.constant 0 : index
    %c0_1 = arith.constant 0 : index
    %0 = vector.load %arg2[%c0, %c0_0, %c0_1] : memref<1x64x16xbf16, #tpu.memory_space<vmem>>, vector<1x64x16xbf16>
    %1 = vector.shape_cast %0 : vector<1x64x16xbf16> to vector<64x16xbf16>
    %c0_2 = arith.constant 0 : index
    %c0_3 = arith.constant 0 : index
    %2 = vector.load %arg3[%c0_2, %c0_3] : memref<16x128xbf16, #tpu.memory_space<vmem>>, vector<16x128xbf16>
    %cst = arith.constant dense<0.000000e+00> : vector<64x128xf32>
    %3 = tpu.matmul %1, %2, %cst {dimension_numbers = #tpu.dot_dimension_numbers<[1], [0], [0], [1], [0, 0, 1, 1], [], []>} : vector<64x16xbf16>, vector<16x128xbf16>, vector<64x128xf32> -> vector<64x128xf32>
    %c0_4 = arith.constant 0 : index
    %c0_5 = arith.constant 0 : index
    %4 = vector.load %arg4[%c0_4, %c0_5] : memref<1x128xf32, #tpu.memory_space<vmem>>, vector<1x128xf32>
    %5 = vector.broadcast %4 : vector<1x128xf32> to vector<64x128xf32>
    %6 = arith.addf %3, %5 : vector<64x128xf32>
    %7 = tpu.iota {dimensions = array<i32: 1>} : vector<64x128xi32>
    %8 = tpu.iota {dimensions = array<i32: 0>} : vector<64x128xi32>
    %c64_i32 = arith.constant 64 : i32
    %9 = arith.muli %arg1, %c64_i32 : i32
    %10 = vector.broadcast %9 : i32 to vector<64x128xi32>
    %11 = arith.addi %8, %10 : vector<64x128xi32>
    %12 = arith.sitofp %11 : vector<64x128xi32> to vector<64x128xf32>
    %cst_6 = arith.constant 5.000000e-01 : f32
    %13 = vector.broadcast %cst_6 : f32 to vector<64x128xf32>
    %14 = arith.addf %12, %13 : vector<64x128xf32>
    %cst_7 = arith.constant 8.000000e+00 : f32
    %15 = vector.broadcast %cst_7 : f32 to vector<64x128xf32>
    %16 = arith.divf %14, %15 : vector<64x128xf32>
    %17 = math.floor %16 : vector<64x128xf32>
    %cst_8 = arith.constant 8.000000e+00 : f32
    %18 = vector.broadcast %cst_8 : f32 to vector<64x128xf32>
    %19 = arith.mulf %17, %18 : vector<64x128xf32>
    %20 = arith.subf %12, %19 : vector<64x128xf32>
    %c0_i32 = arith.constant 0 : i32
    %21 = vector.broadcast %c0_i32 : i32 to vector<64x128xi32>
    %22 = arith.cmpi slt, %7, %21 : vector<64x128xi32>
    %c0_i32_9 = arith.constant 0 : i32
    %23 = vector.broadcast %c0_i32_9 : i32 to vector<64x128xi32>
    %24 = arith.cmpi slt, %7, %23 : vector<64x128xi32>
    %c0_i32_10 = arith.constant 0 : i32
    %25 = vector.broadcast %c0_i32_10 : i32 to vector<64x128xi32>
    %26 = arith.cmpi slt, %7, %25 : vector<64x128xi32>
    %c0_i32_11 = arith.constant 0 : i32
    %27 = vector.broadcast %c0_i32_11 : i32 to vector<64x128xi32>
    %28 = arith.cmpi eq, %7, %27 : vector<64x128xi32>
    %29 = arith.ori %22, %28 : vector<64x128xi1>
    %c1_i32 = arith.constant 1 : i32
    %30 = vector.broadcast %c1_i32 : i32 to vector<64x128xi32>
    %31 = arith.cmpi eq, %7, %30 : vector<64x128xi32>
    %32 = arith.ori %24, %31 : vector<64x128xi1>
    %c2_i32 = arith.constant 2 : i32
    %33 = vector.broadcast %c2_i32 : i32 to vector<64x128xi32>
    %34 = arith.cmpi eq, %7, %33 : vector<64x128xi32>
    %35 = arith.ori %26, %34 : vector<64x128xi1>
    %c3_i32 = arith.constant 3 : i32
    %36 = vector.broadcast %c3_i32 : i32 to vector<64x128xi32>
    %37 = arith.cmpi eq, %7, %36 : vector<64x128xi32>
    %38 = arith.ori %35, %37 : vector<64x128xi1>
    %c7_i32 = arith.constant 7 : i32
    %39 = vector.broadcast %c7_i32 : i32 to vector<64x128xi32>
    %40 = arith.cmpi eq, %7, %39 : vector<64x128xi32>
    %41 = arith.ori %29, %40 : vector<64x128xi1>
    %c8_i32 = arith.constant 8 : i32
    %42 = vector.broadcast %c8_i32 : i32 to vector<64x128xi32>
    %43 = arith.cmpi eq, %7, %42 : vector<64x128xi32>
    %44 = arith.ori %32, %43 : vector<64x128xi1>
    %c9_i32 = arith.constant 9 : i32
    %45 = vector.broadcast %c9_i32 : i32 to vector<64x128xi32>
    %46 = arith.cmpi eq, %7, %45 : vector<64x128xi32>
    %47 = arith.ori %38, %46 : vector<64x128xi1>
    %c10_i32 = arith.constant 10 : i32
    %48 = vector.broadcast %c10_i32 : i32 to vector<64x128xi32>
    %49 = arith.cmpi eq, %7, %48 : vector<64x128xi32>
    %50 = arith.ori %47, %49 : vector<64x128xi1>
    %c14_i32 = arith.constant 14 : i32
    %51 = vector.broadcast %c14_i32 : i32 to vector<64x128xi32>
    %52 = arith.cmpi eq, %7, %51 : vector<64x128xi32>
    %53 = arith.ori %41, %52 : vector<64x128xi1>
    %c15_i32 = arith.constant 15 : i32
    %54 = vector.broadcast %c15_i32 : i32 to vector<64x128xi32>
    %55 = arith.cmpi eq, %7, %54 : vector<64x128xi32>
    %56 = arith.ori %44, %55 : vector<64x128xi1>
    %c16_i32 = arith.constant 16 : i32
    %57 = vector.broadcast %c16_i32 : i32 to vector<64x128xi32>
    %58 = arith.cmpi eq, %7, %57 : vector<64x128xi32>
    %59 = arith.ori %50, %58 : vector<64x128xi1>
    %c17_i32 = arith.constant 17 : i32
    %60 = vector.broadcast %c17_i32 : i32 to vector<64x128xi32>
    %61 = arith.cmpi eq, %7, %60 : vector<64x128xi32>
    %62 = arith.ori %59, %61 : vector<64x128xi1>
    %cst_12 = arith.constant 0.000000e+00 : f32
    %63 = vector.broadcast %cst_12 : f32 to vector<64x128xf32>
    %64 = arith.subf %63, %6 : vector<64x128xf32>
    %65 = arith.select %62, %6, %64 : vector<64x128xi1>, vector<64x128xf32>
    %66 = math.exp %65 : vector<64x128xf32>
    %cst_13 = arith.constant 1.000000e+00 : f32
    %67 = vector.broadcast %cst_13 : f32 to vector<64x128xf32>
    %68 = arith.addf %67, %66 : vector<64x128xf32>
    %cst_14 = arith.constant 1.000000e+00 : f32
    %69 = vector.broadcast %cst_14 : f32 to vector<64x128xf32>
    %70 = arith.divf %69, %68 : vector<64x128xf32>
    %cst_15 = arith.constant 0.000000e+00 : f32
    %71 = vector.broadcast %cst_15 : f32 to vector<64x128xf32>
    %72 = arith.select %56, %17, %71 : vector<64x128xi1>, vector<64x128xf32>
    %73 = arith.select %53, %20, %72 : vector<64x128xi1>, vector<64x128xf32>
    %74 = arith.addf %70, %73 : vector<64x128xf32>
    %cst_16 = arith.constant 2.000000e+00 : f32
    %75 = vector.broadcast %cst_16 : f32 to vector<64x128xf32>
    %76 = arith.mulf %74, %75 : vector<64x128xf32>
    %c0_17 = arith.constant 0 : index
    %c0_18 = arith.constant 0 : index
    %77 = vector.load %arg5[%c0_17, %c0_18] : memref<1x128xf32, #tpu.memory_space<vmem>>, vector<1x128xf32>
    %78 = vector.broadcast %77 : vector<1x128xf32> to vector<64x128xf32>
    %79 = arith.mulf %66, %78 : vector<64x128xf32>
    %80 = arith.ori %53, %56 : vector<64x128xi1>
    %81 = arith.select %62, %79, %70 : vector<64x128xi1>, vector<64x128xf32>
    %82 = arith.select %80, %76, %81 : vector<64x128xi1>, vector<64x128xf32>
    %c0_19 = arith.constant 0 : index
    %c0_20 = arith.constant 0 : index
    %c0_21 = arith.constant 0 : index
    %83 = vector.load %arg6[%c0_19, %c0_20, %c0_21] : memref<1x64x128xf32, #tpu.memory_space<vmem>>, vector<1x64x128xf32>
    %84 = vector.shape_cast %83 : vector<1x64x128xf32> to vector<64x128xf32>
    %85 = vector.shape_cast %82 : vector<64x128xf32> to vector<1x64x128xf32>
    tpu.vector_store %arg6[%c0_19, %c0_20, %c0_21], %85 {strides = array<i32>} : memref<1x64x128xf32, #tpu.memory_space<vmem>>, vector<1x64x128xf32>,
    return
  }
  func.func @transform_0(%arg0: i32, %arg1: i32) -> (i32, i32, i32) {
    %c0_i32 = arith.constant 0 : i32
    %c0_i32_0 = arith.constant 0 : i32
    return %arg0, %arg1, %c0_i32 : i32, i32, i32
  }
  func.func @transform_1(%arg0: i32, %arg1: i32) -> (i32, i32) {
    %c0_i32 = arith.constant 0 : i32
    %c0_i32_0 = arith.constant 0 : i32
    %c0_i32_1 = arith.constant 0 : i32
    return %c0_i32, %c0_i32_0 : i32, i32
  }
  func.func @transform_2(%arg0: i32, %arg1: i32) -> (i32, i32) {
    %c0_i32 = arith.constant 0 : i32
    %c0_i32_0 = arith.constant 0 : i32
    %c0_i32_1 = arith.constant 0 : i32
    return %c0_i32, %c0_i32_0 : i32, i32
  }
  func.func @transform_3(%arg0: i32, %arg1: i32) -> (i32, i32) {
    %c0_i32 = arith.constant 0 : i32
    %c0_i32_0 = arith.constant 0 : i32
    %c0_i32_1 = arith.constant 0 : i32
    return %c0_i32, %c0_i32_0 : i32, i32
  }
  func.func @transform_4(%arg0: i32, %arg1: i32) -> (i32, i32, i32) {
    %c0_i32 = arith.constant 0 : i32
    %c0_i32_0 = arith.constant 0 : i32
    return %arg0, %arg1, %c0_i32 : i32, i32, i32
  }
}

module attributes {stable_mosaic.version = 11 : i64} {
  func.func @_conv_yolo_kernel(%arg0: i32, %arg1: i32, %arg2: memref<1x16x32xbf16, #tpu.memory_space<vmem>>, %arg3: memref<32x128xbf16, #tpu.memory_space<vmem>>, %arg4: memref<1x128xf32, #tpu.memory_space<vmem>>, %arg5: memref<1x128xf32, #tpu.memory_space<vmem>>, %arg6: memref<1x16x128xf32, #tpu.memory_space<vmem>>) attributes {dimension_semantics = [#tpu.dimension_semantics<parallel>, #tpu.dimension_semantics<parallel>], iteration_bounds = array<i64: 2, 1>, scalar_prefetch = 0 : i64, scratch_operands = 0 : i64, tpu.core_type = #tpu.core_type<tc>, window_params = [{transform_indices = @transform_0, window_bounds = array<i64: 1, 16, 32>}, {pipeline_mode = #tpu.pipeline_mode<synchronous>, transform_indices = @transform_1, window_bounds = array<i64: 32, 128>}, {pipeline_mode = #tpu.pipeline_mode<synchronous>, transform_indices = @transform_2, window_bounds = array<i64: 1, 128>}, {pipeline_mode = #tpu.pipeline_mode<synchronous>, transform_indices = @transform_3, window_bounds = array<i64: 1, 128>}, {transform_indices = @transform_4, window_bounds = array<i64: 1, 16, 128>}]} {
    %c0 = arith.constant 0 : index
    %c0_0 = arith.constant 0 : index
    %c0_1 = arith.constant 0 : index
    %0 = vector.load %arg2[%c0, %c0_0, %c0_1] : memref<1x16x32xbf16, #tpu.memory_space<vmem>>, vector<1x16x32xbf16>
    %1 = vector.shape_cast %0 : vector<1x16x32xbf16> to vector<16x32xbf16>
    %c0_2 = arith.constant 0 : index
    %c0_3 = arith.constant 0 : index
    %2 = vector.load %arg3[%c0_2, %c0_3] : memref<32x128xbf16, #tpu.memory_space<vmem>>, vector<32x128xbf16>
    %cst = arith.constant dense<0.000000e+00> : vector<16x128xf32>
    %3 = tpu.matmul %1, %2, %cst {dimension_numbers = #tpu.dot_dimension_numbers<[1], [0], [0], [1], [0, 0, 1, 1], [], []>} : vector<16x32xbf16>, vector<32x128xbf16>, vector<16x128xf32> -> vector<16x128xf32>
    %c0_4 = arith.constant 0 : index
    %c0_5 = arith.constant 0 : index
    %4 = vector.load %arg4[%c0_4, %c0_5] : memref<1x128xf32, #tpu.memory_space<vmem>>, vector<1x128xf32>
    %5 = vector.broadcast %4 : vector<1x128xf32> to vector<16x128xf32>
    %6 = arith.addf %3, %5 : vector<16x128xf32>
    %7 = tpu.iota {dimensions = array<i32: 1>} : vector<16x128xi32>
    %8 = tpu.iota {dimensions = array<i32: 0>} : vector<16x128xi32>
    %c16_i32 = arith.constant 16 : i32
    %9 = arith.muli %arg1, %c16_i32 : i32
    %10 = vector.broadcast %9 : i32 to vector<16x128xi32>
    %11 = arith.addi %8, %10 : vector<16x128xi32>
    %12 = arith.sitofp %11 : vector<16x128xi32> to vector<16x128xf32>
    %cst_6 = arith.constant 5.000000e-01 : f32
    %13 = vector.broadcast %cst_6 : f32 to vector<16x128xf32>
    %14 = arith.addf %12, %13 : vector<16x128xf32>
    %cst_7 = arith.constant 4.000000e+00 : f32
    %15 = vector.broadcast %cst_7 : f32 to vector<16x128xf32>
    %16 = arith.divf %14, %15 : vector<16x128xf32>
    %17 = math.floor %16 : vector<16x128xf32>
    %cst_8 = arith.constant 4.000000e+00 : f32
    %18 = vector.broadcast %cst_8 : f32 to vector<16x128xf32>
    %19 = arith.mulf %17, %18 : vector<16x128xf32>
    %20 = arith.subf %12, %19 : vector<16x128xf32>
    %c0_i32 = arith.constant 0 : i32
    %21 = vector.broadcast %c0_i32 : i32 to vector<16x128xi32>
    %22 = arith.cmpi slt, %7, %21 : vector<16x128xi32>
    %c0_i32_9 = arith.constant 0 : i32
    %23 = vector.broadcast %c0_i32_9 : i32 to vector<16x128xi32>
    %24 = arith.cmpi slt, %7, %23 : vector<16x128xi32>
    %c0_i32_10 = arith.constant 0 : i32
    %25 = vector.broadcast %c0_i32_10 : i32 to vector<16x128xi32>
    %26 = arith.cmpi slt, %7, %25 : vector<16x128xi32>
    %c0_i32_11 = arith.constant 0 : i32
    %27 = vector.broadcast %c0_i32_11 : i32 to vector<16x128xi32>
    %28 = arith.cmpi eq, %7, %27 : vector<16x128xi32>
    %29 = arith.ori %22, %28 : vector<16x128xi1>
    %c1_i32 = arith.constant 1 : i32
    %30 = vector.broadcast %c1_i32 : i32 to vector<16x128xi32>
    %31 = arith.cmpi eq, %7, %30 : vector<16x128xi32>
    %32 = arith.ori %24, %31 : vector<16x128xi1>
    %c2_i32 = arith.constant 2 : i32
    %33 = vector.broadcast %c2_i32 : i32 to vector<16x128xi32>
    %34 = arith.cmpi eq, %7, %33 : vector<16x128xi32>
    %35 = arith.ori %26, %34 : vector<16x128xi1>
    %c3_i32 = arith.constant 3 : i32
    %36 = vector.broadcast %c3_i32 : i32 to vector<16x128xi32>
    %37 = arith.cmpi eq, %7, %36 : vector<16x128xi32>
    %38 = arith.ori %35, %37 : vector<16x128xi1>
    %c7_i32 = arith.constant 7 : i32
    %39 = vector.broadcast %c7_i32 : i32 to vector<16x128xi32>
    %40 = arith.cmpi eq, %7, %39 : vector<16x128xi32>
    %41 = arith.ori %29, %40 : vector<16x128xi1>
    %c8_i32 = arith.constant 8 : i32
    %42 = vector.broadcast %c8_i32 : i32 to vector<16x128xi32>
    %43 = arith.cmpi eq, %7, %42 : vector<16x128xi32>
    %44 = arith.ori %32, %43 : vector<16x128xi1>
    %c9_i32 = arith.constant 9 : i32
    %45 = vector.broadcast %c9_i32 : i32 to vector<16x128xi32>
    %46 = arith.cmpi eq, %7, %45 : vector<16x128xi32>
    %47 = arith.ori %38, %46 : vector<16x128xi1>
    %c10_i32 = arith.constant 10 : i32
    %48 = vector.broadcast %c10_i32 : i32 to vector<16x128xi32>
    %49 = arith.cmpi eq, %7, %48 : vector<16x128xi32>
    %50 = arith.ori %47, %49 : vector<16x128xi1>
    %c14_i32 = arith.constant 14 : i32
    %51 = vector.broadcast %c14_i32 : i32 to vector<16x128xi32>
    %52 = arith.cmpi eq, %7, %51 : vector<16x128xi32>
    %53 = arith.ori %41, %52 : vector<16x128xi1>
    %c15_i32 = arith.constant 15 : i32
    %54 = vector.broadcast %c15_i32 : i32 to vector<16x128xi32>
    %55 = arith.cmpi eq, %7, %54 : vector<16x128xi32>
    %56 = arith.ori %44, %55 : vector<16x128xi1>
    %c16_i32_12 = arith.constant 16 : i32
    %57 = vector.broadcast %c16_i32_12 : i32 to vector<16x128xi32>
    %58 = arith.cmpi eq, %7, %57 : vector<16x128xi32>
    %59 = arith.ori %50, %58 : vector<16x128xi1>
    %c17_i32 = arith.constant 17 : i32
    %60 = vector.broadcast %c17_i32 : i32 to vector<16x128xi32>
    %61 = arith.cmpi eq, %7, %60 : vector<16x128xi32>
    %62 = arith.ori %59, %61 : vector<16x128xi1>
    %cst_13 = arith.constant 0.000000e+00 : f32
    %63 = vector.broadcast %cst_13 : f32 to vector<16x128xf32>
    %64 = arith.subf %63, %6 : vector<16x128xf32>
    %65 = arith.select %62, %6, %64 : vector<16x128xi1>, vector<16x128xf32>
    %66 = math.exp %65 : vector<16x128xf32>
    %cst_14 = arith.constant 1.000000e+00 : f32
    %67 = vector.broadcast %cst_14 : f32 to vector<16x128xf32>
    %68 = arith.addf %67, %66 : vector<16x128xf32>
    %cst_15 = arith.constant 1.000000e+00 : f32
    %69 = vector.broadcast %cst_15 : f32 to vector<16x128xf32>
    %70 = arith.divf %69, %68 : vector<16x128xf32>
    %cst_16 = arith.constant 0.000000e+00 : f32
    %71 = vector.broadcast %cst_16 : f32 to vector<16x128xf32>
    %72 = arith.select %56, %17, %71 : vector<16x128xi1>, vector<16x128xf32>
    %73 = arith.select %53, %20, %72 : vector<16x128xi1>, vector<16x128xf32>
    %74 = arith.addf %70, %73 : vector<16x128xf32>
    %cst_17 = arith.constant 4.000000e+00 : f32
    %75 = vector.broadcast %cst_17 : f32 to vector<16x128xf32>
    %76 = arith.mulf %74, %75 : vector<16x128xf32>
    %c0_18 = arith.constant 0 : index
    %c0_19 = arith.constant 0 : index
    %77 = vector.load %arg5[%c0_18, %c0_19] : memref<1x128xf32, #tpu.memory_space<vmem>>, vector<1x128xf32>
    %78 = vector.broadcast %77 : vector<1x128xf32> to vector<16x128xf32>
    %79 = arith.mulf %66, %78 : vector<16x128xf32>
    %80 = arith.ori %53, %56 : vector<16x128xi1>
    %81 = arith.select %62, %79, %70 : vector<16x128xi1>, vector<16x128xf32>
    %82 = arith.select %80, %76, %81 : vector<16x128xi1>, vector<16x128xf32>
    %c0_20 = arith.constant 0 : index
    %c0_21 = arith.constant 0 : index
    %c0_22 = arith.constant 0 : index
    %83 = vector.load %arg6[%c0_20, %c0_21, %c0_22] : memref<1x16x128xf32, #tpu.memory_space<vmem>>, vector<1x16x128xf32>
    %84 = vector.shape_cast %83 : vector<1x16x128xf32> to vector<16x128xf32>
    %85 = vector.shape_cast %82 : vector<16x128xf32> to vector<1x16x128xf32>
    tpu.vector_store %arg6[%c0_20, %c0_21, %c0_22], %85 {strides = array<i32>} : memref<1x16x128xf32, #tpu.memory_space<vmem>>, vector<1x16x128xf32>,
    return
  }
  func.func @transform_0(%arg0: i32, %arg1: i32) -> (i32, i32, i32) {
    %c0_i32 = arith.constant 0 : i32
    %c0_i32_0 = arith.constant 0 : i32
    return %arg0, %arg1, %c0_i32 : i32, i32, i32
  }
  func.func @transform_1(%arg0: i32, %arg1: i32) -> (i32, i32) {
    %c0_i32 = arith.constant 0 : i32
    %c0_i32_0 = arith.constant 0 : i32
    %c0_i32_1 = arith.constant 0 : i32
    return %c0_i32, %c0_i32_0 : i32, i32
  }
  func.func @transform_2(%arg0: i32, %arg1: i32) -> (i32, i32) {
    %c0_i32 = arith.constant 0 : i32
    %c0_i32_0 = arith.constant 0 : i32
    %c0_i32_1 = arith.constant 0 : i32
    return %c0_i32, %c0_i32_0 : i32, i32
  }
  func.func @transform_3(%arg0: i32, %arg1: i32) -> (i32, i32) {
    %c0_i32 = arith.constant 0 : i32
    %c0_i32_0 = arith.constant 0 : i32
    %c0_i32_1 = arith.constant 0 : i32
    return %c0_i32, %c0_i32_0 : i32, i32
  }
  func.func @transform_4(%arg0: i32, %arg1: i32) -> (i32, i32, i32) {
    %c0_i32 = arith.constant 0 : i32
    %c0_i32_0 = arith.constant 0 : i32
    return %arg0, %arg1, %c0_i32 : i32, i32, i32
  }
}

</mosaic_0001>

<bundles_post_ra>
// kernel: darknet_forward.9
= control target key start
LH: loop header
LB: loop body
LE: loop exit
PB: predicated region body
PF: predicated region fallthrough
CT: control target
= control target key end

     0   :  { %s902_s12 = smov 0   ;;  %s904_s13 = smov 0   ;;  %s1014_s0 = inlined_call_operand.vmem [shape: bf16[2,256,36], index: 0, kind: input, shape index: {}]   ;;  %s1015_s1 = inlined_call_operand.vmem [shape: bf16[36,128], index: 1, kind: input, shape index: {}]   ;;  %s1016_s2 = inlined_call_operand.vmem [shape: f32[1,128], index: 2, kind: input, shape index: {}]   ;;  %s1017_s3 = inlined_call_operand.vmem [shape: bf16[2,256,128], index: 3, kind: output, shape index: {}]  }
   0x1   :  { %s906_s14 = smov 0   ;;  %s908_s15 = smov 0  }
   0x2   :  { %s910_s16 = smov 0  }
   0x3 LB: > { %s22_s17 = sadd.s32 1, %s872_s14  ;;  %s25_s18 = sadd.s32 1, %s876_s15  ;;  %s880_s16 = sphi %s910_s16, %s13_s16   ;;  %s876_s15 = sphi %s908_s15, %s1021_s15   ;;  %s872_s14 = sphi %s906_s14, %s1020_s14   ;;  %s868_s13 = sphi %s904_s13, %s1019_s13   ;;  %s864_s12 = sphi %s902_s12, %s1018_s12  }
   0x4   : > { %p23_p0 = scmp.ge.s32.totalorder %s22_s17, 2  ;;  %p642_p1 = scmp.ge.s32.totalorder %s880_s16, 1 }
   0x5   : > { %p158_p2 = scmp.lt.s32.totalorder %s880_s16, 5 }
   0x6   : > { %s1023_s17 = smov (%p23_p0, %s22_s17), 0  ;;  %s1025_s18 = smov (!%p23_p0, %s25_s18), %s876_s15 }
   0x7   : > { %p159_p3 = pnand %p642_p1, %p158_p2  ;;  %p27_p4 = scmp.ge.s32.totalorder %s1025_s18, 2 }
   0x8   : > { %v831_v0 = vld [vmem:[%s1015_s1] sm:$0xff] (!%p159_p3)   ;;  %v832_v1 = vld [vmem:[%s1015_s1 + $0x8] sm:$0xff] (!%p159_p3)   ;;  %s643_s23 = sshll.u32 (!%p159_p3), %s864_s12, 4  ;;  %p191_p5 = scmp.lt.s32.totalorder (!%p159_p3), %s868_s13, 1  ;;  %vm319_vm0 = vcmask (!%p159_p3), 1041408   ;;  %vm294_vm1 = vcmask (!%p159_p3), 293888  }
   0x9   : > { %s1027_s18 = smov (%p27_p4, %s1025_s18), 0  ;;  %162 = sbr.rel (%p159_p3) target bundleno = 257 (0x101), region = 32 }
   0xa   : > { %761 = vmatprep.subr.bf16.mxu0 (!%p159_p3), %v831_v0  ;;  %783 = vmatprep.subr.bf16.mxu1 (!%p159_p3), %v831_v0  ;;  %p193_p6 = scmp.lt.s32.totalorder (!%p159_p3), %s643_s23, 31  ;;  %v833_v2 = vld [vmem:[%s1015_s1 + $0x10] ss:$0 sps:$4 sm:$0x33] (!%p159_p3)   ;;  %v963_v12 = vld [vmem:[%s1016_s2] ss:$0 sm:$0xff] (!%p159_p3) }
   0xb   : > { %762 = vmatpush3.bf16.msra.mxu0 (!%p159_p3), %v831_v0  ;;  %786 = vmatpush3.bf16.msra.mxu1 (!%p159_p3), %v831_v0  ;;  %v321_v3 = vsel (!%p159_p3), %vm319_vm0, %v833_v2, 0 }
   0xc   : > { %763 = vmatprep.subr.bf16.mxu0 (!%p159_p3), %v832_v1  ;;  %784 = vmatprep.subr.bf16.mxu1 (!%p159_p3), %v832_v1 }
   0xf   : > { %764 = vmatpush3.bf16.msra.mxu0 (!%p159_p3), %v832_v1  ;;  %787 = vmatpush3.bf16.msra.mxu1 (!%p159_p3), %v832_v1 }
  0x10   : > { %s1029_s13 = smov (!%p191_p5, %s868_s13), 1  ;;  %s1031_s23 = smov (!%p193_p6, %s643_s23), 31  ;;  %789 = vmatprep.subr.msk.bf16.mxu0 %vm319_vm0, %v833_v2  ;;  %790 = vmatprep.subr.msk.bf16.mxu1 %vm319_vm0, %v833_v2 }
  0x11   : > { %s644_s26 = sshll.u32 %s1029_s13, 5 }
  0x12   : > { %s944_s27 = sadd.s32 %s644_s26, %s1031_s23 }
  0x13   : > { %s645_s28 = sshll.u32 %s944_s27, 2  ;;  %766 = vmatpush3.bf16.msra.mxu0 %v321_v3  ;;  %788 = vmatpush3.bf16.msra.mxu1 %v321_v3 }
  0x14   : > { %s198_s4 = scalar_lea.vmem %s1014_s0, %s645_s28  ;;  %s978_s9 = scalar_lea.vmem %s1017_s3, %s645_s28 }
  0x15   : > { %v834_v4 = vld [vmem:[%s198_s4] sm:$0xff]   ;;  %v836_v6 = vld [vmem:[%s198_s4 + $0x8] sm:$0xff]   ;;  %v838_v8 = vld [vmem:[%s198_s4 + $0x10] sm:$0xff]  }
  0x16   : > { %v835_v5 = vld [vmem:[%s198_s4 + $0x20] sm:$0xff]   ;;  %767 = vmatprep.mubr.msk.bf16.mxu0 %vm294_vm1, %v834_v4  ;;  %v837_v7 = vld [vmem:[%s198_s4 + $0x28] sm:$0xff]   ;;  %v839_v9 = vld [vmem:[%s198_s4 + $0x30] sm:$0xff]  }
  0x17   : > { %775 = vmatprep.mubr.msk.bf16.mxu1 %vm294_vm1, %v835_v5  ;;  %768 = vmatmul.mubr.msk.bf16.vlgmr.msra.gmra.mrb[0].mxu0 %vm294_vm1, %v836_v6  ;;  %v840_v10 = vld [vmem:[%s198_s4 + $0x18] sm:$0xff]  }
  0x18   : > { %776 = vmatmul.mubr.msk.bf16.vlgmr.msra.gmra.mrb[0].mxu1 %vm294_vm1, %v837_v7  ;;  %771 = vmatprep.mubr.msk.bf16.mxu0 %vm294_vm1, %v838_v8  ;;  %v841_v11 = vld [vmem:[%s198_s4 + $0x38] sm:$0xff]  }
  0x19   : > { %779 = vmatprep.mubr.msk.bf16.mxu1 %vm294_vm1, %v839_v9 }
  0x1f   : > { %772 = vmatmul.mubr.msk.bf16.gmra.mrb[4].mxu0 %vm294_vm1, %v840_v10 }
  0x20   : > { %780 = vmatmul.mubr.msk.bf16.gmra.mrb[4].mxu1 %vm294_vm1, %v841_v11 }
  0xea   : > { %v769_v13 = vpop.f32.mrb[0].mxu0 }
  0xeb   : > { %v366_v14 = vadd.f32 %v769_v13, %v963_v12  ;;  %v777_v15 = vpop.f32.mrb[0].mxu1  ;;  %v357_v16 = vpop.f32.mrb[1].mxu0 }
  0xec   : > { %v398_v17 = vadd.f32 %v777_v15, %v963_v12  ;;  %v358_v18 = vadd.f32 %v963_v12, %v357_v16  ;;  %v389_v19 = vpop.f32.mrb[1].mxu1  ;;  %v770_v20 = vpop.f32.mrb[2].mxu0 }
  0xed   : > { %vm422_vm2 = vcmp.gt.f32.partialorder %v366_v14, 0.0  ;;  %v438_v21 = vmul.f32 0.1, %v366_v14  ;;  %v390_v22 = vadd.f32 %v963_v12, %v389_v19  ;;  %v369_v23 = vadd.f32 %v770_v20, %v963_v12  ;;  %v778_v24 = vpop.f32.mrb[2].mxu1  ;;  %v360_v25 = vpop.f32.mrb[3].mxu0 }
  0xee   : > { %vm430_vm3 = vcmp.gt.f32.partialorder %v398_v17, 0.0  ;;  %v446_v26 = vmul.f32 0.1, %v398_v17  ;;  %v436_v27 = vmul.f32 0.1, %v358_v18  ;;  %vm420_vm4 = vcmp.gt.f32.partialorder %v358_v18, 0.0 }
  0xef   : > { %vm423_vm5 = vcmp.gt.f32.partialorder %v369_v23, 0.0  ;;  %v392_v28 = vpop.f32.mrb[3].mxu1  ;;  %v454_v29 = vsel %vm422_vm2, %v366_v14, %v438_v21  ;;  %vm428_vm6 = vcmp.gt.f32.partialorder %v390_v22, 0.0  ;;  %v439_v30 = vmul.f32 0.1, %v369_v23 }
  0xf0   : > { %v401_v31 = vadd.f32 %v778_v24, %v963_v12  ;;  %v462_v32 = vsel %vm430_vm3, %v398_v17, %v446_v26  ;;  %v444_v33 = vmul.f32 0.1, %v390_v22  ;;  %v361_v34 = vadd.f32 %v963_v12, %v360_v25 }
  0xf1   : > { %v393_v35 = vadd.f32 %v963_v12, %v392_v28  ;;  %v452_v36 = vsel %vm420_vm4, %v358_v18, %v436_v27  ;;  %v455_v37 = vsel %vm423_vm5, %v369_v23, %v439_v30 }
  0xf2   : > { %vm431_vm7 = vcmp.gt.f32.partialorder %v401_v31, 0.0  ;;  %v447_v38 = vmul.f32 0.1, %v401_v31  ;;  %v773_v39 = vpop.f32.mrb[4].mxu0  ;;  %v711_v40 = vpack.c.bf16 %v455_v37, %v454_v29  ;;  %vm421_vm8 = vcmp.gt.f32.partialorder %v361_v34, 0.0 }
  0xf3   : > { %v437_v41 = vmul.f32 0.1, %v361_v34  ;;  %vm429_vm9 = vcmp.gt.f32.partialorder %v393_v35, 0.0  ;;  %v781_v42 = vpop.f32.mrb[4].mxu1  ;;  %v373_v43 = vpop.f32.mrb[5].mxu0  ;;  %v382_v46 = vadd.f32 %v773_v39, %v963_v12  ;;  %v460_v56 = vsel %vm428_vm6, %v390_v22, %v444_v33 }
  0xf4   : > { %v463_v44 = vsel %vm431_vm7, %v401_v31, %v447_v38  ;;  %v445_v45 = vmul.f32 0.1, %v393_v35  ;;  %v414_v47 = vadd.f32 %v781_v42, %v963_v12  ;;  %v405_v48 = vpop.f32.mrb[5].mxu1  ;;  %v774_v49 = vpop.f32.mrb[6].mxu0  ;;  %743 = vst [vmem:[%s978_s9 + $0x8] sm:$0xff] %v711_v40   ;;  %v374_v52 = vadd.f32 %v963_v12, %v373_v43 }
  0xf5   : > { %v731_v50 = vpack.c.bf16 %v463_v44, %v462_v32  ;;  %v453_v51 = vsel %vm421_vm8, %v361_v34, %v437_v41  ;;  %v406_v53 = vadd.f32 %v963_v12, %v405_v48  ;;  %v782_v54 = vpop.f32.mrb[6].mxu1  ;;  %v376_v55 = vpop.f32.mrb[7].mxu0  ;;  %v442_v59 = vmul.f32 0.1, %v382_v46 }
  0xf6   : > { %v706_v57 = vpack.c.bf16 %v453_v51, %v452_v36  ;;  %v461_v58 = vsel %vm429_vm9, %v393_v35, %v445_v45  ;;  %v408_v60 = vpop.f32.mrb[7].mxu1  ;;  %vm426_vm10 = vcmp.gt.f32.partialorder %v382_v46, 0.0  ;;  %vm434_vm11 = vcmp.gt.f32.partialorder %v414_v47, 0.0 }
  0xf7   : > { %747 = vst [vmem:[%s978_s9 + $0x28] sm:$0xff] %v731_v50   ;;  %v726_v61 = vpack.c.bf16 %v461_v58, %v460_v56  ;;  %v450_v62 = vmul.f32 0.1, %v414_v47  ;;  %vm424_vm12 = vcmp.gt.f32.partialorder %v374_v52, 0.0  ;;  %v440_v63 = vmul.f32 0.1, %v374_v52 }
  0xf8   : > { %707 = vst [vmem:[%s978_s9] sm:$0xff] %v706_v57   ;;  %v448_v0 = vmul.f32 0.1, %v406_v53  ;;  %v385_v1 = vadd.f32 %v774_v49, %v963_v12  ;;  %v417_v2 = vadd.f32 %v782_v54, %v963_v12  ;;  %v377_v3 = vadd.f32 %v963_v12, %v376_v55 }
  0xf9   : > { %746 = vst [vmem:[%s978_s9 + $0x20] sm:$0xff] %v726_v61   ;;  %v458_v4 = vsel %vm426_vm10, %v382_v46, %v442_v59  ;;  %v466_v5 = vsel %vm434_vm11, %v414_v47, %v450_v62  ;;  %vm432_vm13 = vcmp.gt.f32.partialorder %v406_v53, 0.0  ;;  %v409_v6 = vadd.f32 %v963_v12, %v408_v60 }
  0xfa   : > { %vm427_vm14 = vcmp.gt.f32.partialorder %v385_v1, 0.0  ;;  %v443_v7 = vmul.f32 0.1, %v385_v1  ;;  %vm435_vm15 = vcmp.gt.f32.partialorder %v417_v2, 0.0  ;;  %v451_v8 = vmul.f32 0.1, %v417_v2 }
  0xfb   : > { %vm425_vm0 = vcmp.gt.f32.partialorder %v377_v3, 0.0  ;;  %v441_v9 = vmul.f32 0.1, %v377_v3  ;;  %vm433_vm1 = vcmp.gt.f32.partialorder %v409_v6, 0.0  ;;  %v449_v10 = vmul.f32 0.1, %v409_v6 }
  0xfc   : > { %v456_v11 = vsel %vm424_vm12, %v374_v52, %v440_v63  ;;  %v464_v13 = vsel %vm432_vm13, %v406_v53, %v448_v0  ;;  %v459_v14 = vsel %vm427_vm14, %v385_v1, %v443_v7  ;;  %v467_v15 = vsel %vm435_vm15, %v417_v2, %v451_v8 }
  0xfd   : > { %v721_v16 = vpack.c.bf16 %v459_v14, %v458_v4  ;;  %v741_v17 = vpack.c.bf16 %v467_v15, %v466_v5  ;;  %v457_v12 = vsel %vm425_vm0, %v377_v3, %v441_v9  ;;  %v465_v18 = vsel %vm433_vm1, %v409_v6, %v449_v10 }
  0xfe   : > { %v716_v19 = vpack.c.bf16 %v457_v12, %v456_v11  ;;  %v736_v20 = vpack.c.bf16 %v465_v18, %v464_v13 }
  0xff   : > { %745 = vst [vmem:[%s978_s9 + $0x18] sm:$0xff] %v721_v16   ;;  %749 = vst [vmem:[%s978_s9 + $0x38] sm:$0xff] %v741_v17  }
 0x100   : > { %744 = vst [vmem:[%s978_s9 + $0x10] sm:$0xff] %v716_v19   ;;  %748 = vst [vmem:[%s978_s9 + $0x30] sm:$0xff] %v736_v20  }
 0x101 PF: > { %s13_s16 = sadd.s32 1, %s880_s16   ;;  %s1018_s12 = smov %s872_s14 }
 0x102   : > { %p10_p7 = scmp.ge.s32.totalorder %s13_s16, 6   ;;  %s1019_s13 = smov %s876_s15 }
 0x103   : > { %s1020_s14 = smov %s1023_s17  ;;  %s1021_s15 = smov %s1027_s18 }
 0x104   :  { %12 = sbr.rel (!%p10_p7) target bundleno = 3 (0x3), region = 62 }

// kernel: darknet_forward.10
= control target key start
LH: loop header
LB: loop body
LE: loop exit
PB: predicated region body
PF: predicated region fallthrough
CT: control target
= control target key end

     0   :  { %s697_s12 = smov 0   ;;  %s699_s13 = smov 0   ;;  %s761_s0 = inlined_call_operand.vmem [shape: bf16[2,64,72], index: 0, kind: input, shape index: {}]   ;;  %s762_s1 = inlined_call_operand.vmem [shape: bf16[72,128], index: 1, kind: input, shape index: {}]   ;;  %s763_s2 = inlined_call_operand.vmem [shape: f32[1,128], index: 2, kind: input, shape index: {}]   ;;  %s764_s3 = inlined_call_operand.vmem [shape: bf16[2,64,128], index: 3, kind: output, shape index: {}]  }
   0x1   :  { %s701_s14 = smov 0  }
   0x2 LB: > { %s25_s15 = sadd.s32 1, %s671_s13  ;;  %p519_p0 = scmp.ge.s32.totalorder %s675_s14, 1  ;;  %s675_s14 = sphi %s701_s14, %s13_s14   ;;  %s671_s13 = sphi %s699_s13, %s766_s13   ;;  %s667_s12 = sphi %s697_s12, %s765_s12  }
   0x3   : > { %p27_p1 = scmp.ge.s32.totalorder %s25_s15, 2  ;;  %p158_p2 = scmp.lt.s32.totalorder %s675_s14, 3 }
   0x5   : > { %s768_s15 = smov (%p27_p1, %s25_s15), 0  ;;  %p159_p3 = pnand %p519_p0, %p158_p2 }
   0x6   : > { %v644_v0 = vld [vmem:[%s762_s1] sm:$0xff] (!%p159_p3)   ;;  %v645_v1 = vld [vmem:[%s762_s1 + $0x8] sm:$0xff] (!%p159_p3)   ;;  %p191_p4 = scmp.lt.s32.totalorder (!%p159_p3), %s667_s12, 1  ;;  %v646_v2 = vld [vmem:[%s762_s1 + $0x10] sm:$0xff] (!%p159_p3)   ;;  %vm282_vm0 = vcmask (!%p159_p3), 588800   ;;  %vm295_vm1 = vcmask (!%p159_p3), 1043456  }
   0x7   : > { %162 = sbr.rel (%p159_p3) target bundleno = 252 (0xfc), region = 32  ;;  %590 = vmatprep.subr.bf16.mxu0 (!%p159_p3), %v644_v0  ;;  %608 = vmatprep.subr.bf16.mxu1 (!%p159_p3), %v644_v0  ;;  %v647_v3 = vld [vmem:[%s762_s1 + $0x18] sm:$0xff] (!%p159_p3)   ;;  %v648_v6 = vld [vmem:[%s762_s1 + $0x20] ss:$0 sps:$4 sm:$0xff] (!%p159_p3)  }
   0x8   : > { %591 = vmatpush3.bf16.msra.mxu0 (!%p159_p3), %v644_v0  ;;  %613 = vmatpush3.bf16.msra.mxu1 (!%p159_p3), %v644_v0  ;;  %v297_v7 = vsel (!%p159_p3), %vm295_vm1, %v648_v6, 0  ;;  %v524_v10 = vld [vmem:[%s763_s2] ss:$0 sm:$0xff] (!%p159_p3) }
   0x9   : > { %592 = vmatprep.subr.bf16.mxu0 (!%p159_p3), %v645_v1  ;;  %609 = vmatprep.subr.bf16.mxu1 (!%p159_p3), %v645_v1 }
   0xc   : > { %593 = vmatpush3.bf16.msra.mxu0 (!%p159_p3), %v645_v1  ;;  %614 = vmatpush3.bf16.msra.mxu1 (!%p159_p3), %v645_v1 }
   0xd   : > { %594 = vmatprep.subr.bf16.mxu0 (!%p159_p3), %v646_v2  ;;  %610 = vmatprep.subr.bf16.mxu1 (!%p159_p3), %v646_v2 }
   0xe   : > { %s770_s12 = smov (!%p191_p4, %s667_s12), 1 }
   0xf   : > { %s548_s22 = sshll.u32 %s770_s12, 5 }
  0x10   : > { %s198_s27 = scalar_lea.vmem %s761_s0, %s548_s22  ;;  %595 = vmatpush3.bf16.msra.mxu0 %v646_v2  ;;  %615 = vmatpush3.bf16.msra.mxu1 %v646_v2  ;;  %s208_s7 = scalar_lea.vmem %s764_s3, %s548_s22 }
  0x11   : > { %v649_v4 = vld [vmem:[%s198_s27] sm:$0xff]   ;;  %v650_v5 = vld [vmem:[%s198_s27 + $0x10] sm:$0xff]   ;;  %596 = vmatprep.subr.bf16.mxu0 %v647_v3  ;;  %611 = vmatprep.subr.bf16.mxu1 %v647_v3  ;;  %v651_v8 = vld [vmem:[%s198_s27 + $0x8] sm:$0xff]  }
  0x12   : > { %600 = vmatprep.mubr.msk.bf16.mxu0 %vm282_vm0, %v649_v4  ;;  %604 = vmatprep.mubr.msk.bf16.mxu1 %vm282_vm0, %v650_v5  ;;  %v652_v9 = vld [vmem:[%s198_s27 + $0x18] sm:$0xff]  }
  0x14   : > { %597 = vmatpush3.bf16.msra.mxu0 %v647_v3  ;;  %616 = vmatpush3.bf16.msra.mxu1 %v647_v3 }
  0x15   : > { %618 = vmatprep.subr.msk.bf16.mxu0 %vm295_vm1, %v648_v6  ;;  %619 = vmatprep.subr.msk.bf16.mxu1 %vm295_vm1, %v648_v6 }
  0x18   : > { %599 = vmatpush3.bf16.msra.mxu0 %v297_v7  ;;  %617 = vmatpush3.bf16.msra.mxu1 %v297_v7 }
  0x1b   : > { %601 = vmatmul.mubr.msk.bf16.vlgmr.msra.gmra.mrb[0].mxu0 %vm282_vm0, %v651_v8  ;;  %605 = vmatmul.mubr.msk.bf16.vlgmr.msra.gmra.mrb[0].mxu1 %vm282_vm0, %v652_v9 }
  0xee   : > { %v602_v11 = vpop.f32.mrb[0].mxu0  ;;  %v606_v12 = vpop.f32.mrb[0].mxu1 }
  0xef   : > { %v342_v13 = vadd.f32 %v602_v11, %v524_v10  ;;  %v358_v14 = vadd.f32 %v606_v12, %v524_v10  ;;  %v333_v15 = vpop.f32.mrb[1].mxu0  ;;  %v349_v16 = vpop.f32.mrb[1].mxu1 }
  0xf0   : > { %v334_v17 = vadd.f32 %v524_v10, %v333_v15  ;;  %v350_v18 = vadd.f32 %v524_v10, %v349_v16  ;;  %v603_v19 = vpop.f32.mrb[2].mxu0  ;;  %v607_v20 = vpop.f32.mrb[2].mxu1 }
  0xf1   : > { %vm366_vm2 = vcmp.gt.f32.partialorder %v342_v13, 0.0  ;;  %v374_v21 = vmul.f32 0.1, %v342_v13  ;;  %vm370_vm3 = vcmp.gt.f32.partialorder %v358_v14, 0.0  ;;  %v378_v22 = vmul.f32 0.1, %v358_v14 }
  0xf2   : > { %vm364_vm4 = vcmp.gt.f32.partialorder %v334_v17, 0.0  ;;  %v372_v23 = vmul.f32 0.1, %v334_v17  ;;  %vm368_vm5 = vcmp.gt.f32.partialorder %v350_v18, 0.0  ;;  %v376_v24 = vmul.f32 0.1, %v350_v18 }
  0xf3   : > { %v345_v25 = vadd.f32 %v603_v19, %v524_v10  ;;  %v361_v26 = vadd.f32 %v607_v20, %v524_v10  ;;  %v336_v27 = vpop.f32.mrb[3].mxu0  ;;  %v352_v28 = vpop.f32.mrb[3].mxu1  ;;  %v382_v29 = vsel %vm366_vm2, %v342_v13, %v374_v21  ;;  %v386_v30 = vsel %vm370_vm3, %v358_v14, %v378_v22 }
  0xf4   : > { %v337_v31 = vadd.f32 %v524_v10, %v336_v27  ;;  %v353_v32 = vadd.f32 %v524_v10, %v352_v28  ;;  %v380_v37 = vsel %vm364_vm4, %v334_v17, %v372_v23  ;;  %v384_v38 = vsel %vm368_vm5, %v350_v18, %v376_v24 }
  0xf5   : > { %vm367_vm6 = vcmp.gt.f32.partialorder %v345_v25, 0.0  ;;  %v375_v33 = vmul.f32 0.1, %v345_v25  ;;  %vm371_vm7 = vcmp.gt.f32.partialorder %v361_v26, 0.0  ;;  %v379_v34 = vmul.f32 0.1, %v361_v26 }
  0xf6   : > { %vm365_vm8 = vcmp.gt.f32.partialorder %v337_v31, 0.0  ;;  %v373_v35 = vmul.f32 0.1, %v337_v31  ;;  %vm369_vm9 = vcmp.gt.f32.partialorder %v353_v32, 0.0  ;;  %v377_v36 = vmul.f32 0.1, %v353_v32 }
  0xf7   : > { %v383_v39 = vsel %vm367_vm6, %v345_v25, %v375_v33  ;;  %v387_v40 = vsel %vm371_vm7, %v361_v26, %v379_v34 }
  0xf8   : > { %v566_v41 = vpack.c.bf16 %v383_v39, %v382_v29  ;;  %v576_v42 = vpack.c.bf16 %v387_v40, %v386_v30  ;;  %v381_v43 = vsel %vm365_vm8, %v337_v31, %v373_v35  ;;  %v385_v44 = vsel %vm369_vm9, %v353_v32, %v377_v36 }
  0xf9   : > { %v561_v45 = vpack.c.bf16 %v381_v43, %v380_v37  ;;  %v571_v46 = vpack.c.bf16 %v385_v44, %v384_v38 }
  0xfa   : > { %578 = vst [vmem:[%s208_s7 + $0x8] sm:$0xff] %v566_v41   ;;  %580 = vst [vmem:[%s208_s7 + $0x18] sm:$0xff] %v576_v42  }
  0xfb   : > { %562 = vst [vmem:[%s208_s7] sm:$0xff] %v561_v45   ;;  %579 = vst [vmem:[%s208_s7 + $0x10] sm:$0xff] %v571_v46  }
  0xfc PF: > { %s13_s14 = sadd.s32 1, %s675_s14   ;;  %s765_s12 = smov %s671_s13 }
  0xfd   : > { %p10_p5 = scmp.ge.s32.totalorder %s13_s14, 4   ;;  %s766_s13 = smov %s768_s15 }
  0xff   :  { %12 = sbr.rel (!%p10_p5) target bundleno = 2 (0x2), region = 62 }

// kernel: darknet_forward.12
= control target key start
LH: loop header
LB: loop body
LE: loop exit
PB: predicated region body
PF: predicated region fallthrough
CT: control target
= control target key end

     0   :  { %s59_s0 = inlined_call_operand.vmem [shape: bf16[16,128], index: 0, kind: input, shape index: {}]   ;;  %s60_s1 = inlined_call_operand.vmem [shape: bf16[16,128], index: 1, kind: input, shape index: {}]   ;;  %s61_s2 = inlined_call_operand.vmem [shape: bf16[16,128], index: 2, kind: output, shape index: {}]  }
   0x1   :  { %v11_v0 = vld [vmem:[%s59_s0] sm:$0xf]  ;;  %v12_v1 = vld [vmem:[%s59_s0 + $0x4] sm:$0xf] }
   0x2   :  { %v13_v2 = vld [vmem:[%s60_s1] sm:$0xf]  ;;  %v14_v3 = vld [vmem:[%s60_s1 + $0x4] sm:$0xf] }
   0x3   :  { %v15_v4 = vadd.bf16 %v13_v2, %v11_v0  ;;  %v16_v5 = vadd.bf16 %v14_v3, %v12_v1 }
   0x5   :  { %v28_v6 = vcombine.low %v15_v4, %v16_v5 }
   0x7   :  { %27 = vst [vmem:[%s61_s2] sm:$0xff] %v28_v6  }

// kernel: darknet_forward.11
= control target key start
LH: loop header
LB: loop body
LE: loop exit
PB: predicated region body
PF: predicated region fallthrough
CT: control target
= control target key end

     0   :  { %s635_s12 = smov 0   ;;  %s637_s13 = smov 0   ;;  %s684_s0 = inlined_call_operand.vmem [shape: bf16[2,64,16], index: 0, kind: input, shape index: {}]   ;;  %s685_s1 = inlined_call_operand.vmem [shape: bf16[16,128], index: 1, kind: input, shape index: {}]   ;;  %s686_s2 = inlined_call_operand.vmem [shape: f32[1,128], index: 2, kind: input, shape index: {}]   ;;  %s687_s3 = inlined_call_operand.vmem [shape: bf16[2,64,128], index: 3, kind: output, shape index: {}]  }
   0x1   :  { %s639_s14 = smov 0  }
   0x2 LB: > { %s25_s15 = sadd.s32 1, %s609_s13  ;;  %p487_p0 = scmp.ge.s32.totalorder %s613_s14, 1  ;;  %s613_s14 = sphi %s639_s14, %s13_s14   ;;  %s609_s13 = sphi %s637_s13, %s689_s13   ;;  %s605_s12 = sphi %s635_s12, %s688_s12  }
   0x3   : > { %p27_p1 = scmp.ge.s32.totalorder %s25_s15, 2  ;;  %p158_p2 = scmp.lt.s32.totalorder %s613_s14, 3 }
   0x5   : > { %s691_s15 = smov (%p27_p1, %s25_s15), 0  ;;  %p159_p3 = pnand %p487_p0, %p158_p2 }
   0x6   : > { %v586_v0 = vld [vmem:[%s685_s1] sm:$0xff] (!%p159_p3)   ;;  %p191_p4 = scmp.lt.s32.totalorder (!%p159_p3), %s605_s12, 1  ;;  %vm254_vm0 = vcmask (!%p159_p3), 130048  }
   0x7   : > { %162 = sbr.rel (%p159_p3) target bundleno = 245 (0xf5), region = 32  ;;  %550 = vmatprep.subr.bf16.mxu0 (!%p159_p3), %v586_v0  ;;  %560 = vmatprep.subr.bf16.mxu1 (!%p159_p3), %v586_v0  ;;  %v492_v5 = vld [vmem:[%s686_s2] ss:$0 sm:$0xff] (!%p159_p3) }
   0x8   : > { %551 = vmatpush3.bf16.msra.mxu0 (!%p159_p3), %v586_v0  ;;  %561 = vmatpush3.bf16.msra.mxu1 (!%p159_p3), %v586_v0 }
   0xe   : > { %s693_s12 = smov (!%p191_p4, %s605_s12), 1 }
   0xf   : > { %s512_s18 = sshll.u32 %s693_s12, 5 }
  0x10   : > { %s198_s21 = scalar_lea.vmem %s684_s0, %s512_s18  ;;  %s208_s26 = scalar_lea.vmem %s687_s3, %s512_s18 }
  0x11   : > { %v587_v1 = vld [vmem:[%s198_s21] sm:$0xff]   ;;  %v588_v2 = vld [vmem:[%s198_s21 + $0x10] sm:$0xff]   ;;  %v589_v3 = vld [vmem:[%s198_s21 + $0x8] sm:$0xff]  }
  0x12   : > { %552 = vmatprep.mubr.msk.bf16.mxu0 %vm254_vm0, %v587_v1  ;;  %556 = vmatprep.mubr.msk.bf16.mxu1 %vm254_vm0, %v588_v2  ;;  %v590_v4 = vld [vmem:[%s198_s21 + $0x18] sm:$0xff]  }
  0x13   : > { %553 = vmatmul.mubr.msk.bf16.vlgmr.msra.gmra.mrb[0].mxu0 %vm254_vm0, %v589_v3  ;;  %557 = vmatmul.mubr.msk.bf16.vlgmr.msra.gmra.mrb[0].mxu1 %vm254_vm0, %v590_v4 }
  0xe6   : > { %v554_v6 = vpop.f32.mrb[0].mxu0  ;;  %v558_v8 = vpop.f32.mrb[0].mxu1 }
  0xe7   : > { %v310_v7 = vadd.f32 %v554_v6, %v492_v5  ;;  %v301_v9 = vpop.f32.mrb[1].mxu0  ;;  %v326_v10 = vadd.f32 %v558_v8, %v492_v5  ;;  %v317_v12 = vpop.f32.mrb[1].mxu1 }
  0xe8   : > { %v302_v11 = vadd.f32 %v492_v5, %v301_v9  ;;  %v555_v13 = vpop.f32.mrb[2].mxu0  ;;  %v318_v15 = vadd.f32 %v492_v5, %v317_v12  ;;  %v559_v17 = vpop.f32.mrb[2].mxu1 }
  0xe9   : > { %v342_v14 = vmul.f32 0.1, %v310_v7  ;;  %v313_v16 = vadd.f32 %v555_v13, %v492_v5  ;;  %v304_v18 = vpop.f32.mrb[3].mxu0  ;;  %vm334_vm1 = vcmp.gt.f32.partialorder %v310_v7, 0.0  ;;  %vm338_vm2 = vcmp.gt.f32.partialorder %v326_v10, 0.0  ;;  %v320_v20 = vpop.f32.mrb[3].mxu1 }
  0xea   : > { %v346_v19 = vmul.f32 0.1, %v326_v10  ;;  %vm332_vm4 = vcmp.gt.f32.partialorder %v302_v11, 0.0  ;;  %v340_v21 = vmul.f32 0.1, %v302_v11  ;;  %v329_v23 = vadd.f32 %v559_v17, %v492_v5 }
  0xeb   : > { %vm335_vm3 = vcmp.gt.f32.partialorder %v313_v16, 0.0  ;;  %v343_v22 = vmul.f32 0.1, %v313_v16  ;;  %v350_v24 = vsel %vm334_vm1, %v310_v7, %v342_v14  ;;  %vm336_vm5 = vcmp.gt.f32.partialorder %v318_v15, 0.0 }
  0xec   : > { %v305_v25 = vadd.f32 %v492_v5, %v304_v18  ;;  %v321_v26 = vadd.f32 %v492_v5, %v320_v20  ;;  %v344_v27 = vmul.f32 0.1, %v318_v15  ;;  %vm339_vm6 = vcmp.gt.f32.partialorder %v329_v23, 0.0 }
  0xed   : > { %v351_v28 = vsel %vm335_vm3, %v313_v16, %v343_v22  ;;  %v347_v29 = vmul.f32 0.1, %v329_v23  ;;  %v354_v32 = vsel %vm338_vm2, %v326_v10, %v346_v19  ;;  %v348_v35 = vsel %vm332_vm4, %v302_v11, %v340_v21 }
  0xee   : > { %v530_v30 = vpack.c.bf16 %v351_v28, %v350_v24  ;;  %vm333_vm7 = vcmp.gt.f32.partialorder %v305_v25, 0.0  ;;  %v341_v31 = vmul.f32 0.1, %v305_v25  ;;  %vm337_vm8 = vcmp.gt.f32.partialorder %v321_v26, 0.0 }
  0xef   : > { %v355_v33 = vsel %vm339_vm6, %v329_v23, %v347_v29  ;;  %v345_v34 = vmul.f32 0.1, %v321_v26  ;;  %v352_v38 = vsel %vm336_vm5, %v318_v15, %v344_v27 }
  0xf0   : > { %542 = vst [vmem:[%s208_s26 + $0x8] sm:$0xff] %v530_v30   ;;  %v540_v36 = vpack.c.bf16 %v355_v33, %v354_v32  ;;  %v349_v37 = vsel %vm333_vm7, %v305_v25, %v341_v31 }
  0xf1   : > { %v525_v39 = vpack.c.bf16 %v349_v37, %v348_v35  ;;  %v353_v40 = vsel %vm337_vm8, %v321_v26, %v345_v34 }
  0xf2   : > { %544 = vst [vmem:[%s208_s26 + $0x18] sm:$0xff] %v540_v36   ;;  %v535_v41 = vpack.c.bf16 %v353_v40, %v352_v38 }
  0xf3   : > { %526 = vst [vmem:[%s208_s26] sm:$0xff] %v525_v39  }
  0xf4   : > { %543 = vst [vmem:[%s208_s26 + $0x10] sm:$0xff] %v535_v41  }
  0xf5 PF: > { %s13_s14 = sadd.s32 1, %s613_s14   ;;  %s688_s12 = smov %s609_s13 }
  0xf6   : > { %p10_p5 = scmp.ge.s32.totalorder %s13_s14, 4   ;;  %s689_s13 = smov %s691_s15 }
  0xf8   :  { %12 = sbr.rel (!%p10_p5) target bundleno = 2 (0x2), region = 62 }

// kernel: darknet_forward.15
= control target key start
LH: loop header
LB: loop body
LE: loop exit
PB: predicated region body
PF: predicated region fallthrough
CT: control target
= control target key end

     0   :  { %s502_s12 = smov 0   ;;  %s504_s13 = smov 0   ;;  %s544_s0 = inlined_call_operand.vmem [shape: bf16[2,16,32], index: 0, kind: input, shape index: {}]   ;;  %s545_s1 = inlined_call_operand.vmem [shape: bf16[32,128], index: 1, kind: input, shape index: {}]   ;;  %s546_s2 = inlined_call_operand.vmem [shape: f32[1,128], index: 2, kind: input, shape index: {}]   ;;  %s547_s3 = inlined_call_operand.vmem [shape: bf16[2,16,128], index: 3, kind: output, shape index: {}]  }
   0x1   :  { %s506_s14 = smov 0  }
   0x2 LB: > { %s25_s15 = sadd.s32 1, %s474_s13  ;;  %p393_p0 = scmp.ge.s32.totalorder %s478_s14, 1  ;;  %s478_s14 = sphi %s506_s14, %s13_s14   ;;  %s474_s13 = sphi %s504_s13, %s549_s13   ;;  %s470_s12 = sphi %s502_s12, %s548_s12  }
   0x3   : > { %p27_p1 = scmp.ge.s32.totalorder %s25_s15, 2  ;;  %p158_p2 = scmp.lt.s32.totalorder %s478_s14, 3 }
   0x5   : > { %s551_s15 = smov (%p27_p1, %s25_s15), 0  ;;  %p159_p3 = pnand %p393_p0, %p158_p2 }
   0x6   : > { %v453_v0 = vld [vmem:[%s545_s1] sm:$0xff] (!%p159_p3)   ;;  %v480_v1 = vmov (!%p159_p3), 0.0   ;;  %v454_v2 = vld [vmem:[%s545_s1 + $0x8] sm:$0xff] (!%p159_p3)   ;;  %vm481_vm0 = vmmov (!%p159_p3), 0   ;;  %p191_p4 = scmp.lt.s32.totalorder (!%p159_p3), %s470_s12, 1  ;;  %vm241_vm1 = vcmask (!%p159_p3), 261120  }
   0x7   : > { %162 = sbr.rel (%p159_p3) target bundleno = 240 (0xf0), region = 32  ;;  %419 = vmatprep.subr.bf16.mxu0 (!%p159_p3), %v480_v1  ;;  %423 = vmatprep.mubr.msk.bf16.mxu0 (!%p159_p3), %vm481_vm0, %v480_v1  ;;  %v398_v4 = vld [vmem:[%s546_s2] ss:$0 sm:$0xff] (!%p159_p3) }
   0x8   : > { %420 = vmatpush3.bf16.msra.mxu0 (!%p159_p3), %v453_v0 }
   0x9   : > { %421 = vmatprep.subr.bf16.mxu0 (!%p159_p3), %v480_v1 }
   0xc   : > { %422 = vmatpush3.bf16.msra.mxu0 (!%p159_p3), %v454_v2 }
   0xe   : > { %s553_s12 = smov (!%p191_p4, %s470_s12), 1 }
   0xf   : > { %s407_s20 = sshll.u32 %s553_s12, 3 }
  0x10   : > { %s198_s23 = scalar_lea.vmem %s544_s0, %s407_s20  ;;  %s208_s28 = scalar_lea.vmem %s547_s3, %s407_s20 }
  0x11   : > { %v455_v3 = vld [vmem:[%s198_s23] sm:$0xff]  }
  0x12   : > { %424 = vmatmul.mubr.msk.bf16.vlgmr.msra.gmra.mrb[0].mxu0 %vm241_vm1, %v455_v3 }
  0xe5   : > { %v279_v5 = vpop.f32.mrb[0].mxu0 }
  0xe6   : > { %v280_v6 = vadd.f32 %v398_v4, %v279_v5  ;;  %v425_v7 = vpop.f32.mrb[1].mxu0 }
  0xe7   : > { %v282_v8 = vpop.f32.mrb[2].mxu0 }
  0xe8   : > { %v288_v9 = vmul.f32 0.1, %v280_v6  ;;  %v283_v10 = vadd.f32 %v398_v4, %v282_v8  ;;  %v426_v11 = vpop.f32.mrb[3].mxu0  ;;  %vm286_vm2 = vcmp.gt.f32.partialorder %v280_v6, 0.0 }
  0xea   : > { %vm287_vm3 = vcmp.gt.f32.partialorder %v283_v10, 0.0  ;;  %v289_v12 = vmul.f32 0.1, %v283_v10  ;;  %v290_v13 = vsel %vm286_vm2, %v280_v6, %v288_v9 }
  0xec   : > { %v291_v14 = vsel %vm287_vm3, %v283_v10, %v289_v12 }
  0xed   : > { %v414_v15 = vpack.c.bf16 %v291_v14, %v290_v13 }
  0xef   : > { %415 = vst [vmem:[%s208_s28] sm:$0xff] %v414_v15  }
  0xf0 PF: > { %s13_s14 = sadd.s32 1, %s478_s14   ;;  %s548_s12 = smov %s474_s13 }
  0xf1   : > { %p10_p5 = scmp.ge.s32.totalorder %s13_s14, 4   ;;  %s549_s13 = smov %s551_s15 }
  0xf3   :  { %12 = sbr.rel (!%p10_p5) target bundleno = 2 (0x2), region = 62 }

// kernel: darknet_forward.13
= control target key start
LH: loop header
LB: loop body
LE: loop exit
PB: predicated region body
PF: predicated region fallthrough
CT: control target
= control target key end

     0   :  { %s572_s12 = smov 0   ;;  %s574_s13 = smov 0   ;;  %s639_s0 = inlined_call_operand.vmem [shape: bf16[2,16,144], index: 0, kind: input, shape index: {}]   ;;  %s640_s1 = inlined_call_operand.vmem [shape: bf16[144,128], index: 1, kind: input, shape index: {}]   ;;  %s641_s2 = inlined_call_operand.vmem [shape: f32[1,128], index: 2, kind: input, shape index: {}]   ;;  %s642_s3 = inlined_call_operand.vmem [shape: bf16[2,16,128], index: 3, kind: output, shape index: {}]  }
   0x1   :  { %s576_s14 = smov 0  }
   0x2 LB: > { %s25_s15 = sadd.s32 1, %s545_s13  ;;  %p459_p0 = scmp.ge.s32.totalorder %s549_s14, 1  ;;  %s549_s14 = sphi %s576_s14, %s13_s14   ;;  %s545_s13 = sphi %s574_s13, %s644_s13   ;;  %s541_s12 = sphi %s572_s12, %s643_s12  }
   0x3   : > { %p27_p1 = scmp.ge.s32.totalorder %s25_s15, 2  ;;  %p159_p2 = scmp.lt.s32.totalorder %s549_s14, 3 }
   0x5   : > { %s646_s15 = smov (%p27_p1, %s25_s15), 0  ;;  %p160_p3 = pnand %p459_p0, %p159_p2 }
   0x6   : > { %v515_v0 = vld [vmem:[%s640_s1] sm:$0xff] (!%p160_p3)   ;;  %v551_v1 = vmov (!%p160_p3), 0   ;;  %p193_p4 = scmp.lt.s32.totalorder (!%p160_p3), %s541_s12, 1  ;;  %v516_v2 = vld [vmem:[%s640_s1 + $0x8] sm:$0xff] (!%p160_p3)   ;;  %v517_v3 = vld [vmem:[%s640_s1 + $0x10] sm:$0xff] (!%p160_p3)   ;;  %vm304_vm0 = vcmask (!%p160_p3), 130048  }
   0x7   : > { %163 = sbr.rel (%p160_p3) target bundleno = 265 (0x109), region = 32  ;;  %308 = vmatprep.subr.bf16.mxu0 (!%p160_p3), %v551_v1  ;;  %v518_v4 = vld [vmem:[%s640_s1 + $0x18] sm:$0xff] (!%p160_p3)   ;;  %v519_v6 = vld [vmem:[%s640_s1 + $0x20] sm:$0xff] (!%p160_p3)   ;;  %v520_v7 = vld [vmem:[%s640_s1 + $0x28] sm:$0xff] (!%p160_p3)  }
   0x8   : > { %309 = vmatpush1.bf16.msra.mxu0 (!%p160_p3), %v515_v0  ;;  %v521_v8 = vld [vmem:[%s640_s1 + $0x30] sm:$0xff] (!%p160_p3)   ;;  %v522_v9 = vld [vmem:[%s640_s1 + $0x38] sm:$0xff] (!%p160_p3)   ;;  %v523_v10 = vld [vmem:[%s640_s1 + $0x40] sm:$0xff] (!%p160_p3)  }
   0x9   : > { %310 = vmatprep.subr.bf16.mxu0 (!%p160_p3), %v551_v1  ;;  %v464_v12 = vld [vmem:[%s641_s2] ss:$0 sm:$0xff] (!%p160_p3) }
   0xc   : > { %311 = vmatpush1.bf16.msra.mxu0 (!%p160_p3), %v516_v2 }
   0xd   : > { %312 = vmatprep.subr.bf16.mxu0 (!%p160_p3), %v551_v1 }
   0xe   : > { %s648_s12 = smov (!%p193_p4, %s541_s12), 1 }
   0xf   : > { %s481_s20 = sshll.u32 %s648_s12, 4  ;;  %s482_s17 = sshll.u32 %s648_s12, 3 }
  0x10   : > { %s201_s25 = scalar_lea.vmem %s639_s0, %s481_s20  ;;  %313 = vmatpush1.bf16.msra.mxu0 %v517_v3  ;;  %s211_s20 = scalar_lea.vmem %s642_s3, %s482_s17 }
  0x11   : > { %v526_v5 = vld [vmem:[%s201_s25 + $0x4] ss:$8 sps:$4 sm:$0xff]   ;;  %314 = vmatprep.subr.bf16.mxu0 %v551_v1  ;;  %v524_v11 = vld [vmem:[%s201_s25] ss:$8 sps:$4 sm:$0xff]  }
  0x12   : > { %476 = vmatprep.mubr.msk.bf16.mxu0 %vm304_vm0, %v526_v5 }
  0x14   : > { %315 = vmatpush1.bf16.msra.mxu0 %v518_v4 }
  0x15   : > { %316 = vmatprep.subr.bf16.mxu0 %v551_v1 }
  0x18   : > { %317 = vmatpush1.bf16.msra.mxu0 %v519_v6 }
  0x19   : > { %318 = vmatprep.subr.bf16.mxu0 %v551_v1 }
  0x1c   : > { %319 = vmatpush1.bf16.msra.mxu0 %v520_v7 }
  0x1d   : > { %320 = vmatprep.subr.bf16.mxu0 %v551_v1 }
  0x20   : > { %321 = vmatpush1.bf16.msra.mxu0 %v521_v8 }
  0x21   : > { %322 = vmatprep.subr.bf16.mxu0 %v551_v1 }
  0x24   : > { %323 = vmatpush1.bf16.msra.mxu0 %v522_v9 }
  0x25   : > { %324 = vmatprep.subr.bf16.mxu0 %v551_v1 }
  0x28   : > { %325 = vmatpush1.bf16.msra.mxu0 %v523_v10 }
  0x2b   : > { %341 = vmatmul.mubr.bf16.vlgmr.msra.gmra.mrb[0].mxu0 %v524_v11 }
  0xfe   : > { %v342_v13 = vpop.f32.mrb[0].mxu0 }
  0xff   : > { %v343_v14 = vadd.f32 %v464_v12, %v342_v13  ;;  %v344_v15 = vpop.f32.mrb[1].mxu0 }
 0x100   : > { %v345_v16 = vpop.f32.mrb[2].mxu0 }
 0x101   : > { %v351_v17 = vmul.f32 0.1, %v343_v14  ;;  %v346_v18 = vadd.f32 %v464_v12, %v345_v16  ;;  %v347_v19 = vpop.f32.mrb[3].mxu0  ;;  %vm349_vm1 = vcmp.gt.f32.partialorder %v343_v14, 0.0 }
 0x103   : > { %vm350_vm2 = vcmp.gt.f32.partialorder %v346_v18, 0.0  ;;  %v352_v20 = vmul.f32 0.1, %v346_v18  ;;  %v353_v21 = vsel %vm349_vm1, %v343_v14, %v351_v17 }
 0x105   : > { %v354_v22 = vsel %vm350_vm2, %v346_v18, %v352_v20 }
 0x106   : > { %v488_v23 = vpack.c.bf16 %v354_v22, %v353_v21 }
 0x108   : > { %489 = vst [vmem:[%s211_s20] sm:$0xff] %v488_v23  }
 0x109 PF: > { %s13_s14 = sadd.s32 1, %s549_s14   ;;  %s643_s12 = smov %s545_s13 }
 0x10a   : > { %p10_p5 = scmp.ge.s32.totalorder %s13_s14, 4   ;;  %s644_s13 = smov %s646_s15 }
 0x10c   :  { %12 = sbr.rel (!%p10_p5) target bundleno = 2 (0x2), region = 62 }

// kernel: darknet_forward.16
= control target key start
LH: loop header
LB: loop body
LE: loop exit
PB: predicated region body
PF: predicated region fallthrough
CT: control target
= control target key end

     0   :  { %s812_s12 = smov 0   ;;  %s814_s13 = smov 0   ;;  %s942_s0 = inlined_call_operand.vmem [shape: bf16[2,64,216], index: 0, kind: input, shape index: {}]   ;;  %s943_s1 = inlined_call_operand.vmem [shape: bf16[216,128], index: 1, kind: input, shape index: {}]   ;;  %s944_s2 = inlined_call_operand.vmem [shape: f32[1,128], index: 2, kind: input, shape index: {}]   ;;  %s945_s3 = inlined_call_operand.vmem [shape: bf16[2,64,128], index: 3, kind: output, shape index: {}]  }
   0x1   :  { %s816_s14 = smov 0  }
   0x2 LB: > { %s25_s15 = sadd.s32 1, %s785_s13  ;;  %p613_p0 = scmp.ge.s32.totalorder %s789_s14, 1  ;;  %s789_s14 = sphi %s816_s14, %s13_s14   ;;  %s785_s13 = sphi %s814_s13, %s947_s13   ;;  %s781_s12 = sphi %s812_s12, %s946_s12  }
   0x3   : > { %p27_p1 = scmp.ge.s32.totalorder %s25_s15, 2  ;;  %p159_p2 = scmp.lt.s32.totalorder %s789_s14, 3 }
   0x5   : > { %s949_s15 = smov (%p27_p1, %s25_s15), 0  ;;  %p160_p3 = pnand %p613_p0, %p159_p2 }
   0x6   : > { %v741_v0 = vld [vmem:[%s943_s1] sm:$0xff] (!%p160_p3)   ;;  %v791_v1 = vmov (!%p160_p3), 0   ;;  %v742_v2 = vld [vmem:[%s943_s1 + $0x8] sm:$0xff] (!%p160_p3)   ;;  %p193_p4 = scmp.lt.s32.totalorder (!%p160_p3), %s781_s12, 1  ;;  %v743_v3 = vld [vmem:[%s943_s1 + $0x10] sm:$0xff] (!%p160_p3)   ;;  %vm373_vm0 = vcmask (!%p160_p3), 719872  }
   0x7   : > { %163 = sbr.rel (%p160_p3) target bundleno = 293 (0x125), region = 32  ;;  %390 = vmatprep.subr.bf16.mxu0 (!%p160_p3), %v791_v1  ;;  %688 = vmatprep.subr.bf16.mxu1 (!%p160_p3), %v791_v1  ;;  %v744_v4 = vld [vmem:[%s943_s1 + $0x18] sm:$0xff] (!%p160_p3)   ;;  %v745_v5 = vld [vmem:[%s943_s1 + $0x20] sm:$0xff] (!%p160_p3)   ;;  %v746_v8 = vld [vmem:[%s943_s1 + $0x28] sm:$0xff] (!%p160_p3)   ;;  %vm386_vm1 = vcmask (!%p160_p3), 1043456  }
   0x8   : > { %391 = vmatpush1.bf16.msra.mxu0 (!%p160_p3), %v741_v0  ;;  %702 = vmatpush1.bf16.msra.mxu1 (!%p160_p3), %v741_v0  ;;  %v747_v9 = vld [vmem:[%s943_s1 + $0x30] sm:$0xff] (!%p160_p3)   ;;  %v748_v10 = vld [vmem:[%s943_s1 + $0x38] sm:$0xff] (!%p160_p3)   ;;  %v749_v11 = vld [vmem:[%s943_s1 + $0x40] sm:$0xff] (!%p160_p3)  }
   0x9   : > { %392 = vmatprep.subr.bf16.mxu0 (!%p160_p3), %v791_v1  ;;  %689 = vmatprep.subr.bf16.mxu1 (!%p160_p3), %v791_v1  ;;  %v750_v12 = vld [vmem:[%s943_s1 + $0x48] sm:$0xff] (!%p160_p3)   ;;  %v751_v13 = vld [vmem:[%s943_s1 + $0x50] sm:$0xff] (!%p160_p3)   ;;  %v752_v14 = vld [vmem:[%s943_s1 + $0x58] sm:$0xff] (!%p160_p3)  }
   0xa   : > { %v753_v15 = vld [vmem:[%s943_s1 + $0x60] sm:$0xff] (!%p160_p3)   ;;  %v754_v16 = vld [vmem:[%s943_s1 + $0x68] ss:$0 sps:$4 sm:$0xff] (!%p160_p3)  }
   0xb   : > { %v388_v17 = vsel (!%p160_p3), %vm386_vm1, %v754_v16, 0  ;;  %v618_v24 = vld [vmem:[%s944_s2] ss:$0 sm:$0xff] (!%p160_p3) }
   0xc   : > { %393 = vmatpush1.bf16.msra.mxu0 (!%p160_p3), %v742_v2  ;;  %703 = vmatpush1.bf16.msra.mxu1 (!%p160_p3), %v742_v2 }
   0xd   : > { %394 = vmatprep.subr.bf16.mxu0 (!%p160_p3), %v791_v1  ;;  %690 = vmatprep.subr.bf16.mxu1 (!%p160_p3), %v791_v1 }
   0xe   : > { %s951_s12 = smov (!%p193_p4, %s781_s12), 1 }
   0xf   : > { %s655_s22 = sshll.u32 %s951_s12, 6 }
  0x10   : > { %395 = vmatpush1.bf16.msra.mxu0 %v743_v3  ;;  %704 = vmatpush1.bf16.msra.mxu1 %v743_v3  ;;  %s856_s27 = scalar_lea.vmem %s942_s0, %s655_s22 }
  0x11   : > { %396 = vmatprep.subr.bf16.mxu0 %v791_v1  ;;  %691 = vmatprep.subr.bf16.mxu1 %v791_v1  ;;  %v757_v6 = vld [vmem:[%s856_s27 + $0x4] ss:$8 sps:$4 sm:$0xff]   ;;  %v755_v18 = vld [vmem:[%s856_s27] ss:$8 sps:$4 sm:$0xff]   ;;  %v761_v20 = vld [vmem:[%s856_s27 + $0x14] ss:$8 sps:$4 sm:$0xff]  }
  0x12   : > { %641 = vmatprep.mubr.msk.bf16.mxu0 %vm373_vm0, %v757_v6  ;;  %v760_v7 = vld [vmem:[%s856_s27 + $0x24] ss:$8 sps:$4 sm:$0xff]   ;;  %v758_v19 = vld [vmem:[%s856_s27 + $0x20] ss:$8 sps:$4 sm:$0xff]   ;;  %v763_v21 = vld [vmem:[%s856_s27 + $0x34] ss:$8 sps:$4 sm:$0xff]  }
  0x13   : > { %643 = vmatprep.mubr.msk.bf16.mxu1 %vm373_vm0, %v760_v7  ;;  %v765_v22 = vld [vmem:[%s856_s27 + $0x10] ss:$8 sps:$4 sm:$0xff]  }
  0x14   : > { %397 = vmatpush1.bf16.msra.mxu0 %v744_v4  ;;  %705 = vmatpush1.bf16.msra.mxu1 %v744_v4  ;;  %v766_v23 = vld [vmem:[%s856_s27 + $0x30] ss:$8 sps:$4 sm:$0xff]   ;;  %s656_s27 = sshll.u32 %s951_s12, 5 }
  0x15   : > { %398 = vmatprep.subr.bf16.mxu0 %v791_v1  ;;  %692 = vmatprep.subr.bf16.mxu1 %v791_v1  ;;  %s927_s30 = scalar_lea.vmem %s945_s3, %s656_s27 }
  0x18   : > { %399 = vmatpush1.bf16.msra.mxu0 %v745_v5  ;;  %706 = vmatpush1.bf16.msra.mxu1 %v745_v5 }
  0x19   : > { %400 = vmatprep.subr.bf16.mxu0 %v791_v1  ;;  %693 = vmatprep.subr.bf16.mxu1 %v791_v1 }
  0x1c   : > { %401 = vmatpush1.bf16.msra.mxu0 %v746_v8  ;;  %707 = vmatpush1.bf16.msra.mxu1 %v746_v8 }
  0x1d   : > { %402 = vmatprep.subr.bf16.mxu0 %v791_v1  ;;  %694 = vmatprep.subr.bf16.mxu1 %v791_v1 }
  0x20   : > { %403 = vmatpush1.bf16.msra.mxu0 %v747_v9  ;;  %708 = vmatpush1.bf16.msra.mxu1 %v747_v9 }
  0x21   : > { %404 = vmatprep.subr.bf16.mxu0 %v791_v1  ;;  %695 = vmatprep.subr.bf16.mxu1 %v791_v1 }
  0x24   : > { %405 = vmatpush1.bf16.msra.mxu0 %v748_v10  ;;  %709 = vmatpush1.bf16.msra.mxu1 %v748_v10 }
  0x25   : > { %406 = vmatprep.subr.bf16.mxu0 %v791_v1  ;;  %696 = vmatprep.subr.bf16.mxu1 %v791_v1 }
  0x28   : > { %407 = vmatpush1.bf16.msra.mxu0 %v749_v11  ;;  %710 = vmatpush1.bf16.msra.mxu1 %v749_v11 }
  0x29   : > { %408 = vmatprep.subr.bf16.mxu0 %v791_v1  ;;  %697 = vmatprep.subr.bf16.mxu1 %v791_v1 }
  0x2c   : > { %409 = vmatpush1.bf16.msra.mxu0 %v750_v12  ;;  %711 = vmatpush1.bf16.msra.mxu1 %v750_v12 }
  0x2d   : > { %410 = vmatprep.subr.bf16.mxu0 %v791_v1  ;;  %698 = vmatprep.subr.bf16.mxu1 %v791_v1 }
  0x30   : > { %411 = vmatpush1.bf16.msra.mxu0 %v751_v13  ;;  %712 = vmatpush1.bf16.msra.mxu1 %v751_v13 }
  0x31   : > { %412 = vmatprep.subr.bf16.mxu0 %v791_v1  ;;  %699 = vmatprep.subr.bf16.mxu1 %v791_v1 }
  0x34   : > { %413 = vmatpush1.bf16.msra.mxu0 %v752_v14  ;;  %713 = vmatpush1.bf16.msra.mxu1 %v752_v14 }
  0x35   : > { %414 = vmatprep.subr.bf16.mxu0 %v791_v1  ;;  %700 = vmatprep.subr.bf16.mxu1 %v791_v1 }
  0x38   : > { %415 = vmatpush1.bf16.msra.mxu0 %v753_v15  ;;  %714 = vmatpush1.bf16.msra.mxu1 %v753_v15 }
  0x39   : > { %416 = vmatprep.subr.bf16.mxu0 %v791_v1  ;;  %701 = vmatprep.subr.bf16.mxu1 %v791_v1 }
  0x3c   : > { %417 = vmatpush1.bf16.msra.mxu0 %v388_v17  ;;  %715 = vmatpush1.bf16.msra.mxu1 %v388_v17 }
  0x3f   : > { %423 = vmatmul.mubr.bf16.vlgmr.msra.gmra.mrb[0].mxu0 %v755_v18  ;;  %439 = vmatmul.mubr.bf16.vlgmr.msra.gmra.mrb[0].mxu1 %v758_v19 }
  0x40   : > { %642 = vmatprep.mubr.msk.bf16.mxu0 %vm373_vm0, %v761_v20  ;;  %644 = vmatprep.mubr.msk.bf16.mxu1 %vm373_vm0, %v763_v21 }
  0x47   : > { %431 = vmatmul.mubr.bf16.gmra.mrb[4].mxu0 %v765_v22  ;;  %447 = vmatmul.mubr.bf16.gmra.mrb[4].mxu1 %v766_v23 }
 0x112   : > { %v424_v25 = vpop.f32.mrb[0].mxu0  ;;  %v440_v26 = vpop.f32.mrb[0].mxu1 }
 0x113   : > { %v425_v27 = vadd.f32 %v618_v24, %v424_v25  ;;  %v441_v28 = vadd.f32 %v618_v24, %v440_v26  ;;  %v426_v29 = vpop.f32.mrb[1].mxu0  ;;  %v442_v30 = vpop.f32.mrb[1].mxu1 }
 0x114   : > { %v427_v31 = vpop.f32.mrb[2].mxu0  ;;  %v443_v32 = vpop.f32.mrb[2].mxu1 }
 0x115   : > { %v463_v33 = vmul.f32 0.1, %v425_v27  ;;  %v467_v34 = vmul.f32 0.1, %v441_v28  ;;  %v428_v35 = vadd.f32 %v618_v24, %v427_v31  ;;  %v444_v36 = vadd.f32 %v618_v24, %v443_v32  ;;  %v429_v37 = vpop.f32.mrb[3].mxu0  ;;  %v445_v38 = vpop.f32.mrb[3].mxu1 }
 0x116   : > { %vm455_vm2 = vcmp.gt.f32.partialorder %v425_v27, 0.0  ;;  %vm459_vm3 = vcmp.gt.f32.partialorder %v441_v28, 0.0 }
 0x117   : > { %vm456_vm4 = vcmp.gt.f32.partialorder %v428_v35, 0.0  ;;  %v464_v39 = vmul.f32 0.1, %v428_v35  ;;  %vm460_vm5 = vcmp.gt.f32.partialorder %v444_v36, 0.0  ;;  %v468_v40 = vmul.f32 0.1, %v444_v36 }
 0x118   : > { %v471_v41 = vsel %vm455_vm2, %v425_v27, %v463_v33  ;;  %v475_v42 = vsel %vm459_vm3, %v441_v28, %v467_v34 }
 0x119   : > { %v472_v43 = vsel %vm456_vm4, %v428_v35, %v464_v39  ;;  %v476_v44 = vsel %vm460_vm5, %v444_v36, %v468_v40 }
 0x11a   : > { %v432_v45 = vpop.f32.mrb[4].mxu0  ;;  %v448_v46 = vpop.f32.mrb[4].mxu1  ;;  %v668_v47 = vpack.c.bf16 %v472_v43, %v471_v41  ;;  %v678_v48 = vpack.c.bf16 %v476_v44, %v475_v42 }
 0x11b   : > { %v433_v49 = vadd.f32 %v618_v24, %v432_v45  ;;  %v449_v50 = vadd.f32 %v618_v24, %v448_v46  ;;  %v434_v51 = vpop.f32.mrb[5].mxu0  ;;  %v450_v52 = vpop.f32.mrb[5].mxu1 }
 0x11c   : > { %v435_v53 = vpop.f32.mrb[6].mxu0  ;;  %v451_v54 = vpop.f32.mrb[6].mxu1  ;;  %669 = vst [vmem:[%s927_s30] sm:$0xff] %v668_v47   ;;  %686 = vst [vmem:[%s927_s30 + $0x10] sm:$0xff] %v678_v48  }
 0x11d   : > { %v465_v55 = vmul.f32 0.1, %v433_v49  ;;  %v469_v56 = vmul.f32 0.1, %v449_v50  ;;  %v436_v57 = vadd.f32 %v618_v24, %v435_v53  ;;  %v452_v58 = vadd.f32 %v618_v24, %v451_v54  ;;  %v437_v59 = vpop.f32.mrb[7].mxu0  ;;  %v453_v60 = vpop.f32.mrb[7].mxu1 }
 0x11e   : > { %vm457_vm6 = vcmp.gt.f32.partialorder %v433_v49, 0.0  ;;  %vm461_vm7 = vcmp.gt.f32.partialorder %v449_v50, 0.0 }
 0x11f   : > { %vm458_vm8 = vcmp.gt.f32.partialorder %v436_v57, 0.0  ;;  %v466_v61 = vmul.f32 0.1, %v436_v57  ;;  %vm462_vm9 = vcmp.gt.f32.partialorder %v452_v58, 0.0  ;;  %v470_v62 = vmul.f32 0.1, %v452_v58 }
 0x120   : > { %v473_v63 = vsel %vm457_vm6, %v433_v49, %v465_v55  ;;  %v477_v0 = vsel %vm461_vm7, %v449_v50, %v469_v56 }
 0x121   : > { %v474_v1 = vsel %vm458_vm8, %v436_v57, %v466_v61  ;;  %v478_v2 = vsel %vm462_vm9, %v452_v58, %v470_v62 }
 0x122   : > { %v673_v3 = vpack.c.bf16 %v474_v1, %v473_v63  ;;  %v683_v4 = vpack.c.bf16 %v478_v2, %v477_v0 }
 0x124   : > { %685 = vst [vmem:[%s927_s30 + $0x8] sm:$0xff] %v673_v3   ;;  %687 = vst [vmem:[%s927_s30 + $0x18] sm:$0xff] %v683_v4  }
 0x125 PF: > { %s13_s14 = sadd.s32 1, %s789_s14   ;;  %s946_s12 = smov %s785_s13 }
 0x126   : > { %p10_p5 = scmp.ge.s32.totalorder %s13_s14, 4   ;;  %s947_s13 = smov %s949_s15 }
 0x128   :  { %12 = sbr.rel (!%p10_p5) target bundleno = 2 (0x2), region = 62 }

// kernel: darknet_forward.17
= control target key start
LH: loop header
LB: loop body
LE: loop exit
PB: predicated region body
PF: predicated region fallthrough
CT: control target
= control target key end

     0   :  { %s820_s15 = smov 0   ;;  %s822_s16 = smov 0   ;;  %s1092_s0 = inlined_call_operand.vmem [shape: bf16[2,64,16], index: 0, kind: input, shape index: {}]   ;;  %s1093_s1 = inlined_call_operand.vmem [shape: bf16[16,128], index: 1, kind: input, shape index: {}]   ;;  %s1094_s2 = inlined_call_operand.vmem [shape: f32[1,128], index: 2, kind: input, shape index: {}]   ;;  %s1095_s3 = inlined_call_operand.vmem [shape: f32[1,128], index: 3, kind: input, shape index: {}]   ;;  %s1096_s4 = inlined_call_operand.vmem [shape: f32[2,64,128], index: 4, kind: output, shape index: {}]  }
   0x1   :  { %s824_s17 = smov 0  }
   0x2 LB: > { %s26_s18 = sadd.s32 1, %s789_s16  ;;  %p673_p0 = scmp.ge.s32.totalorder %s793_s17, 1  ;;  %s793_s17 = sphi %s824_s17, %s14_s17   ;;  %s789_s16 = sphi %s822_s16, %s1108_s16   ;;  %s785_s15 = sphi %s820_s15, %s1107_s15  }
   0x3   : > { %p28_p1 = scmp.ge.s32.totalorder %s26_s18, 2  ;;  %p183_p2 = scmp.lt.s32.totalorder %s793_s17, 3 }
   0x5   : > { %s1110_s18 = smov (%p28_p1, %s26_s18), 0  ;;  %p184_p3 = pnand %p673_p0, %p183_p2 }
   0x6   : > { %v734_v0 = vld [vmem:[%s1093_s1] sm:$0xff] (!%p184_p3)   ;;  %p218_p4 = scmp.lt.s32.totalorder (!%p184_p3), %s785_s15, 1  ;;  %vm281_vm0 = vcmask (!%p184_p3), 130048   ;;  %v359_v5 = vlaneseq (!%p184_p3) }
   0x7   : > { %187 = sbr.rel (%p184_p3) target bundleno = 275 (0x113), region = 36  ;;  %698 = vmatprep.subr.bf16.mxu0 (!%p184_p3), %v734_v0  ;;  %708 = vmatprep.subr.bf16.mxu1 (!%p184_p3), %v734_v0  ;;  %v678_v18 = vld [vmem:[%s1094_s2] ss:$0 sm:$0xff] (!%p184_p3) }
   0x8   : > { %699 = vmatpush3.bf16.msra.mxu0 (!%p184_p3), %v734_v0  ;;  %709 = vmatpush3.bf16.msra.mxu1 (!%p184_p3), %v734_v0  ;;  %v847_v6 = vshrl.u32 (!%p184_p3), %v359_v5, 7  ;;  %v849_v7 = vand.u32 (!%p184_p3), 127, %v359_v5 }
   0xa   : > { %v852_v8 = vadd.s32 (!%p184_p3), 16, %v847_v6  ;;  %vm434_vm1 = vcmp.eq.s32.totalorder (!%p184_p3), %v849_v7, 2  ;;  %vm436_vm2 = vcmp.eq.s32.totalorder (!%p184_p3), %v849_v7, 3  ;;  %vm442_vm4 = vcmp.eq.s32.totalorder (!%p184_p3), %v849_v7, 9 }
   0xb   : > { %vm437_vm3 = vmor (!%p184_p3), %vm434_vm1, %vm436_vm2  ;;  %v861_v11 = vadd.s32 (!%p184_p3), 48, %v847_v6  ;;  %vm444_vm6 = vcmp.eq.s32.totalorder (!%p184_p3), %v849_v7, 10  ;;  %v865_v12 = vadd.s32 (!%p184_p3), 32, %v847_v6  ;;  %vm450_vm8 = vcmp.eq.s32.totalorder (!%p184_p3), %v849_v7, 16 }
   0xc   : > { %v382_v9 = vcvt.s32.f32 (!%p184_p3), %v852_v8  ;;  %vm443_vm5 = vmor (!%p184_p3), %vm437_vm3, %vm442_vm4  ;;  %v380_v15 = vcvt.s32.f32 (!%p184_p3), %v847_v6  ;;  %v874_v17 = vadd.s32 (!%p184_p3), 24, %v847_v6  ;;  %v880_v19 = vadd.s32 (!%p184_p3), 56, %v847_v6 }
   0xd   : > { %vm445_vm7 = vmor (!%p184_p3), %vm443_vm5, %vm444_vm6  ;;  %v386_v14 = vcvt.s32.f32 (!%p184_p3), %v861_v11  ;;  %v384_v16 = vcvt.s32.f32 (!%p184_p3), %v865_v12  ;;  %v883_v20 = vadd.s32 (!%p184_p3), 8, %v847_v6  ;;  %vm452_vm10 = vcmp.eq.s32.totalorder (!%p184_p3), %v849_v7, 17 }
   0xe   : > { %s1112_s15 = smov (!%p218_p4, %s785_s15), 1  ;;  %v390_v10 = vadd.f32 0.5, %v382_v9  ;;  %vm451_vm9 = vmor %vm445_vm7, %vm450_vm8  ;;  %v887_v21 = vadd.s32 40, %v847_v6  ;;  %v388_v28 = vadd.f32 0.5, %v380_v15  ;;  %v383_v30 = vcvt.s32.f32 %v874_v17 }
   0xf   : > { %s691_s21 = sshll.u32 %s1112_s15, 5  ;;  %v394_v24 = vadd.f32 0.5, %v386_v14  ;;  %v392_v29 = vadd.f32 0.5, %v384_v16  ;;  %vm897_vm11 = vmor %vm451_vm9, %vm452_vm10  ;;  %v387_v36 = vcvt.s32.f32 %v880_v19  ;;  %v381_v37 = vcvt.s32.f32 %v883_v20  ;;  %s692_s29 = sshll.u32 %s1112_s15, 6 }
  0x10   : > { %s225_s24 = scalar_lea.vmem %s1092_s0, %s691_s21  ;;  %v867_v13 = vmul.f32 0.125, %v390_v10  ;;  %vm432_vm12 = vcmp.eq.s32.totalorder %v849_v7, 1  ;;  %vm440_vm13 = vcmp.eq.s32.totalorder %v849_v7, 8  ;;  %v385_v43 = vcvt.s32.f32 %v887_v21  ;;  %s1040_s6 = scalar_lea.vmem %s1096_s4, %s692_s29 }
  0x11   : > { %v735_v1 = vld [vmem:[%s225_s24] sm:$0xff]   ;;  %v736_v2 = vld [vmem:[%s225_s24 + $0x10] sm:$0xff]   ;;  %v737_v3 = vld [vmem:[%s225_s24 + $0x8] sm:$0xff]   ;;  %v395_v5 = vadd.f32 0.5, %v387_v36  ;;  %v389_v10 = vadd.f32 0.5, %v381_v37  ;;  %vm448_vm15 = vcmp.eq.s32.totalorder %v849_v7, 15 }
  0x12   : > { %700 = vmatprep.mubr.msk.bf16.mxu0 %vm281_vm0, %v735_v1  ;;  %704 = vmatprep.mubr.msk.bf16.mxu1 %vm281_vm0, %v736_v2  ;;  %v738_v4 = vld [vmem:[%s225_s24 + $0x18] sm:$0xff]   ;;  %v407_v23 = vfloor.f32 %v867_v13  ;;  %vm441_vm14 = vmor %vm432_vm12, %vm440_vm13  ;;  %vm430_vm1 = vcmp.eq.s32.totalorder %v849_v7, 0  ;;  %vm438_vm2 = vcmp.eq.s32.totalorder %v849_v7, 7  ;;  %vm446_vm3 = vcmp.eq.s32.totalorder %v849_v7, 14 }
  0x13   : > { %701 = vmatmul.mubr.msk.bf16.vlgmr.msra.gmra.mrb[0].mxu0 %vm281_vm0, %v737_v3  ;;  %705 = vmatmul.mubr.msk.bf16.vlgmr.msra.gmra.mrb[0].mxu1 %vm281_vm0, %v738_v4  ;;  %v403_v3 = vmul.f32 0.125, %v394_v24  ;;  %v391_v4 = vadd.f32 0.5, %v383_v30  ;;  %v393_v24 = vadd.f32 0.5, %v385_v43  ;;  %vm937_vm0 = vmor %vm441_vm14, %vm448_vm15 }
  0x14   : > { %vm967_vm4 = vmor %vm430_vm1, %vm438_vm2 }
  0x15   : > { %vm981_vm5 = vmor %vm967_vm4, %vm446_vm3 }
  0x16   : > { %vm1031_vm6 = vmor %vm981_vm5, %vm937_vm0 }
  0xe6   : > { %v702_v22 = vpop.f32.mrb[0].mxu0  ;;  %v706_v26 = vpop.f32.mrb[0].mxu1 }
  0xe7   : > { %v337_v25 = vadd.f32 %v702_v22, %v678_v18  ;;  %v328_v27 = vpop.f32.mrb[1].mxu0  ;;  %v353_v32 = vadd.f32 %v706_v26, %v678_v18  ;;  %v344_v34 = vpop.f32.mrb[1].mxu1 }
  0xe8   : > { %v329_v33 = vadd.f32 %v678_v18, %v328_v27  ;;  %v703_v35 = vpop.f32.mrb[2].mxu0  ;;  %v345_v39 = vadd.f32 %v678_v18, %v344_v34  ;;  %v707_v41 = vpop.f32.mrb[2].mxu1  ;;  %v397_v27 = vmul.f32 0.125, %v388_v28  ;;  %v415_v34 = vmul.f32 8.0, %v407_v23 }
  0xe9   : > { %v456_v38 = vsub.f32 0.0, %v337_v25  ;;  %v340_v40 = vadd.f32 %v703_v35, %v678_v18  ;;  %v331_v42 = vpop.f32.mrb[3].mxu0  ;;  %v460_v44 = vsub.f32 0.0, %v353_v32  ;;  %v356_v46 = vadd.f32 %v707_v41, %v678_v18  ;;  %v347_v48 = vpop.f32.mrb[3].mxu1 }
  0xea   : > { %v454_v45 = vsub.f32 0.0, %v329_v33  ;;  %v332_v47 = vadd.f32 %v678_v18, %v331_v42  ;;  %v458_v50 = vsub.f32 0.0, %v345_v39  ;;  %v348_v52 = vadd.f32 %v678_v18, %v347_v48 }
  0xeb   : > { %v464_v49 = vsel %vm897_vm11, %v337_v25, %v456_v38  ;;  %v457_v51 = vsub.f32 0.0, %v340_v40  ;;  %v468_v54 = vsel %vm897_vm11, %v353_v32, %v460_v44  ;;  %v461_v56 = vsub.f32 0.0, %v356_v46 }
  0xec   : > { %v474_v53 = vmul.f32 1.442695, %v464_v49  ;;  %v462_v55 = vsel %vm897_vm11, %v329_v33, %v454_v45  ;;  %v482_v57 = vmul.f32 1.442695, %v468_v54  ;;  %v466_v59 = vsel %vm897_vm11, %v345_v39, %v458_v50 }
  0xed   : > { %v470_v58 = vmul.f32 1.442695, %v462_v55  ;;  %v465_v60 = vsel %vm897_vm11, %v340_v40, %v457_v51  ;;  %v478_v61 = vmul.f32 1.442695, %v466_v59  ;;  %v469_v63 = vsel %vm897_vm11, %v356_v46, %v461_v56 }
  0xee   : > { %739 = vpow2.f32 %v474_v53  ;;  %v476_v62 = vmul.f32 1.442695, %v465_v60  ;;  %v484_v0 = vmul.f32 1.442695, %v469_v63  ;;  %v455_v1 = vsub.f32 0.0, %v332_v47 }
  0xef   : > { %741 = vpow2.f32 %v482_v57  ;;  %v459_v2 = vsub.f32 0.0, %v348_v52  ;;  %v401_v32 = vmul.f32 0.125, %v392_v29  ;;  %v411_v33 = vfloor.f32 %v403_v3 }
  0xf0   : > { %743 = vpow2.f32 %v470_v58  ;;  %v463_v18 = vsel %vm897_vm11, %v332_v47, %v455_v1  ;;  %v400_v35 = vmul.f32 0.125, %v391_v4  ;;  %v404_v38 = vmul.f32 0.125, %v395_v5 }
  0xf1   : > { %745 = vpow2.f32 %v478_v61  ;;  %v467_v22 = vsel %vm897_vm11, %v348_v52, %v459_v2  ;;  %v472_v25 = vmul.f32 1.442695, %v463_v18  ;;  %v398_v39 = vmul.f32 0.125, %v389_v10 }
  0xf2   : > { %747 = vpow2.f32 %v476_v62  ;;  %v480_v26 = vmul.f32 1.442695, %v467_v22  ;;  %v402_v40 = vmul.f32 0.125, %v393_v24  ;;  %v405_v29 = vfloor.f32 %v397_v27 }
  0xf3   : > { %749 = vpow2.f32 %v484_v0  ;;  %v409_v41 = vfloor.f32 %v401_v32  ;;  %v419_v44 = vmul.f32 8.0, %v411_v33  ;;  %v423_v46 = vsub.f32 %v382_v9, %v415_v34 }
  0xf4   : > { %751 = vpow2.f32 %v472_v25  ;;  %v408_v48 = vfloor.f32 %v400_v35  ;;  %v412_v49 = vfloor.f32 %v404_v38  ;;  %v512_v51 = vsel %vm937_vm0, %v407_v23, 0.0 }
  0xf5   : > { %753 = vpow2.f32 %v480_v26  ;;  %v406_v53 = vfloor.f32 %v398_v39  ;;  %v410_v54 = vfloor.f32 %v402_v40  ;;  %v413_v56 = vmul.f32 8.0, %v405_v29 }
  0xf6   : > { %v417_v9 = vmul.f32 8.0, %v409_v41  ;;  %v427_v58 = vsub.f32 %v386_v14, %v419_v44  ;;  %v516_v13 = vsel %vm937_vm0, %v411_v33, 0.0  ;;  %v416_v61 = vmul.f32 8.0, %v408_v48 }
  0xf7   : > { %v420_v63 = vmul.f32 8.0, %v412_v49  ;;  %v414_v0 = vmul.f32 8.0, %v406_v53  ;;  %v418_v1 = vmul.f32 8.0, %v410_v54  ;;  %v421_v3 = vsub.f32 %v380_v15, %v413_v56 }
  0xf8   : > { %v941_v42 = vpop.eup %739  ;;  %v425_v4 = vsub.f32 %v384_v16, %v417_v9  ;;  %v510_v18 = vsel %vm937_vm0, %v405_v29, 0.0  ;;  %v514_v6 = vsel %vm937_vm0, %v409_v41, 0.0  ;;  %v424_v15 = vsub.f32 %v383_v30, %v416_v61  ;;  %v688_v30 = vld [vmem:[%s1095_s3] ss:$0 sm:$0xff] }
  0xf9   : > { %v946_v45 = vpop.eup %741  ;;  %v488_v47 = vadd.f32 1.0, %v941_v42  ;;  %v513_v7 = vsel %vm937_vm0, %v408_v48, 0.0  ;;  %v428_v16 = vsub.f32 %v387_v36, %v420_v63  ;;  %v517_v22 = vsel %vm937_vm0, %v412_v49, 0.0 }
  0xfa   : > { %v951_v50 = vpop.eup %743  ;;  %v492_v52 = vadd.f32 1.0, %v946_v45  ;;  %v422_v25 = vsub.f32 %v381_v37, %v414_v0  ;;  %v426_v24 = vsub.f32 %v385_v43, %v418_v1  ;;  %v520_v17 = vsel %vm981_vm5, %v423_v46, %v512_v51 }
  0xfb   : > { %v746_v55 = vpop.eup %745  ;;  %755 = vrcp.f32 %v488_v47  ;;  %v486_v8 = vadd.f32 1.0, %v951_v50  ;;  %v511_v19 = vsel %vm937_vm0, %v406_v53, 0.0  ;;  %v515_v36 = vsel %vm937_vm0, %v410_v54, 0.0 }
  0xfc   : > { %v748_v57 = vpop.eup %747  ;;  %757 = vrcp.f32 %v492_v52  ;;  %v490_v59 = vadd.f32 1.0, %v746_v55  ;;  %v524_v20 = vsel %vm981_vm5, %v427_v58, %v516_v13  ;;  %v518_v21 = vsel %vm981_vm5, %v421_v3, %v510_v18 }
  0xfd   : > { %v750_v23 = vpop.eup %749  ;;  %759 = vrcp.f32 %v486_v8  ;;  %v489_v62 = vadd.f32 1.0, %v748_v57  ;;  %v522_v43 = vsel %vm981_vm5, %v425_v4, %v514_v6  ;;  %v521_v26 = vsel %vm981_vm5, %v424_v15, %v513_v7 }
  0xfe   : > { %v752_v11 = vpop.eup %751  ;;  %761 = vrcp.f32 %v490_v59  ;;  %v493_v14 = vadd.f32 1.0, %v750_v23  ;;  %v525_v27 = vsel %vm981_vm5, %v428_v16, %v517_v22  ;;  %v551_v34 = vmul.f32 %v941_v42, %v688_v30 }
  0xff   : > { %v971_v2 = vpop.eup %753  ;;  %763 = vrcp.f32 %v489_v62  ;;  %v487_v5 = vadd.f32 1.0, %v752_v11  ;;  %v519_v35 = vsel %vm981_vm5, %v422_v25, %v511_v19  ;;  %v523_v38 = vsel %vm981_vm5, %v426_v24, %v515_v36 }
 0x100   : > { %765 = vrcp.f32 %v493_v14  ;;  %v491_v12 = vadd.f32 1.0, %v971_v2  ;;  %v555_v41 = vmul.f32 %v946_v45, %v688_v30  ;;  %v549_v42 = vmul.f32 %v951_v50, %v688_v30 }
 0x101   : > { %767 = vrcp.f32 %v487_v5  ;;  %v553_v44 = vmul.f32 %v746_v55, %v688_v30  ;;  %v552_v48 = vmul.f32 %v748_v57, %v688_v30  ;;  %v556_v49 = vmul.f32 %v750_v23, %v688_v30 }
 0x102   : > { %769 = vrcp.f32 %v491_v12  ;;  %v550_v50 = vmul.f32 %v752_v11, %v688_v30  ;;  %v554_v18 = vmul.f32 %v971_v2, %v688_v30 }
 0x105   : > { %v756_v37 = vpop.eup %755 }
 0x106   : > { %v758_v32 = vpop.eup %757  ;;  %v528_v33 = vadd.f32 %v756_v37, %v520_v17  ;;  %v560_v52 = vsel %vm897_vm11, %v551_v34, %v756_v37 }
 0x107   : > { %v760_v39 = vpop.eup %759  ;;  %v532_v29 = vadd.f32 %v758_v32, %v524_v20  ;;  %v564_v56 = vsel %vm897_vm11, %v555_v41, %v758_v32 }
 0x108   : > { %v762_v46 = vpop.eup %761  ;;  %v536_v28 = vmul.f32 2.0, %v528_v33  ;;  %v526_v47 = vadd.f32 %v760_v39, %v518_v21  ;;  %v558_v13 = vsel %vm897_vm11, %v549_v42, %v760_v39 }
 0x109   : > { %v764_v51 = vpop.eup %763  ;;  %v540_v45 = vmul.f32 2.0, %v532_v29  ;;  %v530_v53 = vadd.f32 %v762_v46, %v522_v43  ;;  %v562_v62 = vsel %vm897_vm11, %v553_v44, %v762_v46 }
 0x10a   : > { %v766_v54 = vpop.eup %765  ;;  %v568_v55 = vsel %vm1031_vm6, %v536_v28, %v560_v52  ;;  %v534_v8 = vmul.f32 2.0, %v526_v47  ;;  %v529_v9 = vadd.f32 %v764_v51, %v521_v26  ;;  %v561_v0 = vsel %vm897_vm11, %v552_v48, %v764_v51 }
 0x10b   : > { %v768_v57 = vpop.eup %767  ;;  %576 = vst [vmem:[%s1040_s6 + $0x10] sm:$0xff] %v568_v55  ;;  %v572_v58 = vsel %vm1031_vm6, %v540_v45, %v564_v56  ;;  %v538_v59 = vmul.f32 2.0, %v530_v53  ;;  %v533_v23 = vadd.f32 %v766_v54, %v525_v27  ;;  %v565_v5 = vsel %vm897_vm11, %v556_v49, %v766_v54 }
 0x10c   : > { %v770_v60 = vpop.eup %769  ;;  %580 = vst [vmem:[%s1040_s6 + $0x30] sm:$0xff] %v572_v58  ;;  %v566_v61 = vsel %vm1031_vm6, %v534_v8, %v558_v13  ;;  %v537_v63 = vmul.f32 2.0, %v529_v9  ;;  %v527_v11 = vadd.f32 %v768_v57, %v519_v35  ;;  %v559_v12 = vsel %vm897_vm11, %v550_v50, %v768_v57 }
 0x10d   : > { %574 = vst [vmem:[%s1040_s6] sm:$0xff] %v566_v61  ;;  %v570_v14 = vsel %vm1031_vm6, %v538_v59, %v562_v62  ;;  %v541_v1 = vmul.f32 2.0, %v533_v23  ;;  %v531_v3 = vadd.f32 %v770_v60, %v523_v38  ;;  %v563_v16 = vsel %vm897_vm11, %v554_v18, %v770_v60 }
 0x10e   : > { %578 = vst [vmem:[%s1040_s6 + $0x20] sm:$0xff] %v570_v14  ;;  %v569_v4 = vsel %vm1031_vm6, %v537_v63, %v561_v0  ;;  %v535_v10 = vmul.f32 2.0, %v527_v11 }
 0x10f   : > { %577 = vst [vmem:[%s1040_s6 + $0x18] sm:$0xff] %v569_v4  ;;  %v573_v6 = vsel %vm1031_vm6, %v541_v1, %v565_v5  ;;  %v539_v15 = vmul.f32 2.0, %v531_v3 }
 0x110   : > { %581 = vst [vmem:[%s1040_s6 + $0x38] sm:$0xff] %v573_v6  ;;  %v567_v7 = vsel %vm1031_vm6, %v535_v10, %v559_v12 }
 0x111   : > { %575 = vst [vmem:[%s1040_s6 + $0x8] sm:$0xff] %v567_v7  ;;  %v571_v22 = vsel %vm1031_vm6, %v539_v15, %v563_v16 }
 0x112   : > { %579 = vst [vmem:[%s1040_s6 + $0x28] sm:$0xff] %v571_v22 }
 0x113 PF: > { %s14_s17 = sadd.s32 1, %s793_s17   ;;  %s1107_s15 = smov %s789_s16 }
 0x114   : > { %p11_p5 = scmp.ge.s32.totalorder %s14_s17, 4   ;;  %s1108_s16 = smov %s1110_s18 }
 0x116   :  { %13 = sbr.rel (!%p11_p5) target bundleno = 2 (0x2), region = 66 }

// kernel: darknet_forward.14
= control target key start
LH: loop header
LB: loop body
LE: loop exit
PB: predicated region body
PF: predicated region fallthrough
CT: control target
= control target key end

     0   :  { %s603_s15 = smov 0   ;;  %s605_s16 = smov 0   ;;  %s684_s0 = inlined_call_operand.vmem [shape: bf16[2,16,32], index: 0, kind: input, shape index: {}]   ;;  %s685_s1 = inlined_call_operand.vmem [shape: bf16[32,128], index: 1, kind: input, shape index: {}]   ;;  %s686_s2 = inlined_call_operand.vmem [shape: f32[1,128], index: 2, kind: input, shape index: {}]   ;;  %s687_s3 = inlined_call_operand.vmem [shape: f32[1,128], index: 3, kind: input, shape index: {}]   ;;  %s688_s4 = inlined_call_operand.vmem [shape: f32[2,16,128], index: 4, kind: output, shape index: {}]  }
   0x1   :  { %s607_s17 = smov 0  }
   0x2 LB: > { %s26_s18 = sadd.s32 1, %s570_s16  ;;  %p489_p0 = scmp.ge.s32.totalorder %s574_s17, 1  ;;  %s574_s17 = sphi %s607_s17, %s14_s17   ;;  %s570_s16 = sphi %s605_s16, %s696_s16   ;;  %s566_s15 = sphi %s603_s15, %s695_s15  }
   0x3   : > { %p28_p1 = scmp.ge.s32.totalorder %s26_s18, 2  ;;  %p183_p2 = scmp.lt.s32.totalorder %s574_s17, 3 }
   0x5   : > { %s698_s18 = smov (%p28_p1, %s26_s18), 0  ;;  %p184_p3 = pnand %p489_p0, %p183_p2 }
   0x6   : > { %v541_v0 = vld [vmem:[%s685_s1] sm:$0xff] (!%p184_p3)   ;;  %v576_v1 = vmov (!%p184_p3), 0.0   ;;  %v542_v2 = vld [vmem:[%s685_s1 + $0x8] sm:$0xff] (!%p184_p3)   ;;  %vm577_vm0 = vmmov (!%p184_p3), 0   ;;  %p218_p4 = scmp.lt.s32.totalorder (!%p184_p3), %s566_s15, 1  ;;  %vm268_vm1 = vcmask (!%p184_p3), 261120   ;;  %v313_v4 = vlaneseq (!%p184_p3) }
   0x7   : > { %187 = sbr.rel (%p184_p3) target bundleno = 269 (0x10d), region = 36  ;;  %507 = vmatprep.subr.bf16.mxu0 (!%p184_p3), %v576_v1  ;;  %511 = vmatprep.mubr.msk.bf16.mxu0 (!%p184_p3), %vm577_vm0, %v576_v1  ;;  %v494_v6 = vld [vmem:[%s686_s2] ss:$0 sm:$0xff] (!%p184_p3) }
   0x8   : > { %508 = vmatpush3.bf16.msra.mxu0 (!%p184_p3), %v541_v0  ;;  %v314_v5 = vand.u32 (!%p184_p3), 127, %v313_v4  ;;  %v316_v7 = vshrl.u32 (!%p184_p3), %v313_v4, 7  ;;  %v499_v43 = vld [vmem:[%s687_s3] ss:$0 sm:$0xff] (!%p184_p3) }
   0x9   : > { %509 = vmatprep.subr.bf16.mxu0 (!%p184_p3), %v576_v1 }
   0xa   : > { %vm340_vm2 = vcmp.eq.s32.totalorder (!%p184_p3), %v314_v5, 2  ;;  %vm342_vm3 = vcmp.eq.s32.totalorder (!%p184_p3), %v314_v5, 3  ;;  %vm348_vm5 = vcmp.eq.s32.totalorder (!%p184_p3), %v314_v5, 9  ;;  %vm350_vm7 = vcmp.eq.s32.totalorder (!%p184_p3), %v314_v5, 10 }
   0xb   : > { %vm343_vm4 = vmor (!%p184_p3), %vm340_vm2, %vm342_vm3  ;;  %vm356_vm9 = vcmp.eq.s32.totalorder (!%p184_p3), %v314_v5, 16  ;;  %vm358_vm11 = vcmp.eq.s32.totalorder (!%p184_p3), %v314_v5, 17  ;;  %v317_v13 = vadd.s32 (!%p184_p3), 8, %v316_v7  ;;  %v322_v17 = vcvt.s32.f32 (!%p184_p3), %v316_v7 }
   0xc   : > { %510 = vmatpush3.bf16.msra.mxu0 (!%p184_p3), %v542_v2  ;;  %vm349_vm6 = vmor (!%p184_p3), %vm343_vm4, %vm348_vm5  ;;  %vm338_vm13 = vcmp.eq.s32.totalorder (!%p184_p3), %v314_v5, 1  ;;  %vm346_vm14 = vcmp.eq.s32.totalorder (!%p184_p3), %v314_v5, 8  ;;  %vm336_vm15 = vcmp.eq.s32.totalorder (!%p184_p3), %v314_v5, 0  ;;  %vm344_vm0 = vcmp.eq.s32.totalorder (!%p184_p3), %v314_v5, 7 }
   0xd   : > { %vm351_vm8 = vmor (!%p184_p3), %vm349_vm6, %vm350_vm7  ;;  %v323_v21 = vcvt.s32.f32 (!%p184_p3), %v317_v13  ;;  %v324_v24 = vadd.f32 (!%p184_p3), 0.5, %v322_v17  ;;  %vm354_vm2 = vcmp.eq.s32.totalorder (!%p184_p3), %v314_v5, 15  ;;  %vm352_vm4 = vcmp.eq.s32.totalorder (!%p184_p3), %v314_v5, 14 }
   0xe   : > { %s700_s15 = smov (!%p218_p4, %s566_s15), 1  ;;  %vm357_vm10 = vmor %vm351_vm8, %vm356_vm9 }
   0xf   : > { %s502_s23 = sshll.u32 %s700_s15, 3  ;;  %vm636_vm12 = vmor %vm357_vm10, %vm358_vm11  ;;  %v325_v25 = vadd.f32 0.5, %v323_v21  ;;  %v327_v26 = vmul.f32 0.25, %v324_v24  ;;  %s503_s5 = sshll.u32 %s700_s15, 4 }
  0x10   : > { %s225_s26 = scalar_lea.vmem %s684_s0, %s502_s23  ;;  %vm345_vm3 = vmor %vm336_vm15, %vm344_vm0  ;;  %s235_s8 = scalar_lea.vmem %s688_s4, %s503_s5 }
  0x11   : > { %v543_v3 = vld [vmem:[%s225_s26] sm:$0xff]   ;;  %v328_v27 = vmul.f32 0.25, %v325_v25  ;;  %v329_v28 = vfloor.f32 %v327_v26  ;;  %vm648_vm6 = vmor %vm345_vm3, %vm352_vm4 }
  0x12   : > { %512 = vmatmul.mubr.msk.bf16.vlgmr.msra.gmra.mrb[0].mxu0 %vm268_vm1, %v543_v3  ;;  %vm347_vm1 = vmor %vm338_vm13, %vm346_vm14 }
  0x13   : > { %v330_v30 = vfloor.f32 %v328_v27  ;;  %v331_v33 = vmul.f32 4.0, %v329_v28  ;;  %vm644_vm5 = vmor %vm347_vm1, %vm354_vm2 }
  0x14   : > { %v374_v39 = vsel %vm644_vm5, %v329_v28, 0.0  ;;  %vm391_vm7 = vmor %vm648_vm6, %vm644_vm5 }
  0x15   : > { %v332_v35 = vmul.f32 4.0, %v330_v30  ;;  %v333_v37 = vsub.f32 %v322_v17, %v331_v33  ;;  %v375_v41 = vsel %vm644_vm5, %v330_v30, 0.0 }
  0x17   : > { %v334_v40 = vsub.f32 %v323_v21, %v332_v35  ;;  %v376_v42 = vsel %vm648_vm6, %v333_v37, %v374_v39 }
  0x19   : > { %v377_v45 = vsel %vm648_vm6, %v334_v40, %v375_v41 }
  0xe5   : > { %v306_v8 = vpop.f32.mrb[0].mxu0 }
  0xe6   : > { %v307_v9 = vadd.f32 %v494_v6, %v306_v8  ;;  %v513_v10 = vpop.f32.mrb[1].mxu0 }
  0xe7   : > { %v309_v12 = vpop.f32.mrb[2].mxu0 }
  0xe8   : > { %v360_v14 = vsub.f32 0.0, %v307_v9  ;;  %v310_v15 = vadd.f32 %v494_v6, %v309_v12  ;;  %v514_v16 = vpop.f32.mrb[3].mxu0 }
  0xea   : > { %v362_v18 = vsel %vm636_vm12, %v307_v9, %v360_v14  ;;  %v361_v19 = vsub.f32 0.0, %v310_v15 }
  0xeb   : > { %v364_v20 = vmul.f32 1.442695, %v362_v18 }
  0xec   : > { %v363_v22 = vsel %vm636_vm12, %v310_v15, %v361_v19 }
  0xed   : > { %544 = vpow2.f32 %v364_v20  ;;  %v366_v23 = vmul.f32 1.442695, %v363_v22 }
  0xef   : > { %546 = vpow2.f32 %v366_v23 }
  0xf7   : > { %v545_v29 = vpop.eup %544 }
  0xf8   : > { %v368_v31 = vadd.f32 1.0, %v545_v29  ;;  %v389_v48 = vmul.f32 %v545_v29, %v499_v43 }
  0xf9   : > { %v547_v32 = vpop.eup %546 }
  0xfa   : > { %548 = vrcp.f32 %v368_v31  ;;  %v369_v34 = vadd.f32 1.0, %v547_v32  ;;  %v390_v52 = vmul.f32 %v547_v32, %v499_v43 }
  0xfc   : > { %550 = vrcp.f32 %v369_v34 }
 0x104   : > { %v549_v44 = vpop.eup %548 }
 0x105   : > { %v378_v46 = vadd.f32 %v549_v44, %v376_v42  ;;  %v392_v51 = vsel %vm636_vm12, %v389_v48, %v549_v44 }
 0x106   : > { %v551_v47 = vpop.eup %550 }
 0x107   : > { %v380_v49 = vmul.f32 4.0, %v378_v46  ;;  %v379_v50 = vadd.f32 %v551_v47, %v377_v45  ;;  %v393_v55 = vsel %vm636_vm12, %v390_v52, %v551_v47 }
 0x109   : > { %v394_v53 = vsel %vm391_vm7, %v380_v49, %v392_v51  ;;  %v381_v54 = vmul.f32 4.0, %v379_v50 }
 0x10a   : > { %396 = vst [vmem:[%s235_s8] sm:$0xff] %v394_v53 }
 0x10b   : > { %v395_v56 = vsel %vm391_vm7, %v381_v54, %v393_v55 }
 0x10c   : > { %397 = vst [vmem:[%s235_s8 + $0x8] sm:$0xff] %v395_v56 }
 0x10d PF: > { %s14_s17 = sadd.s32 1, %s574_s17   ;;  %s695_s15 = smov %s570_s16 }
 0x10e   : > { %p11_p5 = scmp.ge.s32.totalorder %s14_s17, 4   ;;  %s696_s16 = smov %s698_s18 }
 0x110   :  { %13 = sbr.rel (!%p11_p5) target bundleno = 2 (0x2), region = 66 }

</bundles_post_ra>
